<compile_context>
chip_gen: v6e
topology: v6e:2x2x1
jax: 0.10.0
libtpu: 0.0.40
codegen_flags: <defaults>
</compile_context>

<pallas_src>
import functools

import jax
import jax.numpy as jnp
from jax.experimental import pallas as pl
from jax.experimental.pallas import tpu as pltpu

LANE = 128


def _round_up(n, m):
    return ((n + m - 1) // m) * m


# ----------------------------------------------------------------------------
# Kernel
# ----------------------------------------------------------------------------
def autoencoder_kernel(x_ref, w1_ref, wmid_ref, w6_ref, bh_ref, b6_ref, out_ref):
    f32, bf16 = jnp.float32, jnp.bfloat16

    x = x_ref[...].astype(bf16)

    # ----- encoder -----
    h = jnp.dot(x, w1_ref[...], preferred_element_type=f32) + bh_ref[0]
    h = jnp.maximum(h, 0.0)                                               # ReLU
    h = jnp.dot(h.astype(bf16), wmid_ref[0], preferred_element_type=f32) + bh_ref[1]
    h = jnp.maximum(h, 0.0)                                               # ReLU
    # bottleneck (no ReLU)
    h = jnp.dot(h.astype(bf16), wmid_ref[1], preferred_element_type=f32) + bh_ref[2]

    # ----- decoder -----
    h = jnp.dot(h.astype(bf16), wmid_ref[2], preferred_element_type=f32) + bh_ref[3]
    h = jnp.maximum(h, 0.0)                                               # ReLU
    h = jnp.dot(h.astype(bf16), wmid_ref[3], preferred_element_type=f32) + bh_ref[4]
    h = jnp.maximum(h, 0.0)                                               # ReLU
    h = jnp.dot(h.astype(bf16), w6_ref[...], preferred_element_type=f32) + b6_ref[...]

    out_ref[...] = h.astype(out_ref.dtype)


# ----------------------------------------------------------------------------
# One-time parameter preparation (outside jit; call once at init)
# ----------------------------------------------------------------------------
def prepare_params(params, lane=LANE):
    """Zero-pad hidden widths (64/32/16) to `lane`, pad D to a multiple of
    `lane`, cast weights to bf16 (MXU operands), keep biases f32, and pack the
    four 128x128 middle weights / five (1,128) biases into single arrays.

    Exact by construction: padded weight rows/cols and bias entries are 0, so
    padded activation lanes stay exactly 0 through every layer.
    """
    n = len(params)
    assert n == 6, "expected 6 Linear layers"
    D_in = params[0][0].shape[0]
    D_out = params[-1][0].shape[1]
    assert D_in == D_out
    D_pad = _round_up(D_in, lane)

    padded = []
    for i, (w, b) in enumerate(params):
        fi, fo = w.shape
        fi_p = D_pad if i == 0 else lane
        fo_p = D_pad if i == n - 1 else lane
        wp = jnp.zeros((fi_p, fo_p), jnp.float32).at[:fi, :fo].set(w)
        bp = jnp.zeros((fo_p,), jnp.float32).at[:fo].set(b)
        padded.append((wp, bp))

    w1 = padded[0][0].astype(jnp.bfloat16)                                  # (D_pad, 128)
    wmid = jnp.stack([padded[i][0] for i in range(1, 5)]).astype(jnp.bfloat16)  # (4,128,128)
    w6 = padded[5][0].astype(jnp.bfloat16)                                  # (128, D_pad)
    b_head = jnp.stack([padded[i][1] for i in range(0, 5)])[:, None, :]     # (5,1,128) f32
    b6 = padded[5][1][None, :]                                              # (1, D_pad) f32
    return (w1, wmid, w6, b_head, b6)


# ----------------------------------------------------------------------------
# Forward pass
# ----------------------------------------------------------------------------
@functools.partial(jax.jit, static_argnames=("tile_b",))
def autoencoder_forward(x, prepared, tile_b=2048):
    """x: (B, D) float32. prepared: output of prepare_params()."""
    w1, wmid, w6, b_head, b6 = prepared
    B, D = x.shape
    D_pad = w1.shape[0]

    if D_pad != D:
        # Lane-dense feature dim (avoids masked partial stores on the output).
        x = jnp.pad(x, ((0, 0), (0, D_pad - D)))

    # ---- batch tile selection ----
    tb = min(tile_b, _round_up(B, 8))                    # no bigger than the batch
    if B >= 16:
        tb = min(tb, _round_up((B + 1) // 2, 8))         # keep >=2 grid steps (v7x megacore)
    # Keep double-buffered f32 x/out tiles (+ weights) under v5e's 16 MiB
    # default scoped VMEM without needing a vmem_limit override.
    bytes_per_row = 2 * 2 * D_pad * 4                    # x + out, double-buffered, f32
    vmem_cap_rows = max(8, ((12 * 1024 * 1024) // bytes_per_row) // 8 * 8)
    tb = max(8, min(tb, vmem_cap_rows))

    grid = (pl.cdiv(B, tb),)

    out = pl.pallas_call(
        autoencoder_kernel,
        out_shape=jax.ShapeDtypeStruct((B, D_pad), jnp.float32),
        grid=grid,
        in_specs=[
            pl.BlockSpec((tb, D_pad), lambda i: (i, 0)),          # x (batch-tiled)
            pl.BlockSpec((D_pad, LANE), lambda i: (0, 0)),        # W1  (VMEM-resident)
            pl.BlockSpec((4, LANE, LANE), lambda i: (0, 0, 0)),   # W2..W5 packed
            pl.BlockSpec((LANE, D_pad), lambda i: (0, 0)),        # W6
            pl.BlockSpec((5, 1, LANE), lambda i: (0, 0, 0)),      # b1..b5 packed
            pl.BlockSpec((1, D_pad), lambda i: (0, 0)),           # b6
        ],
        out_specs=pl.BlockSpec((tb, D_pad), lambda i: (i, 0)),
        compiler_params=pltpu.CompilerParams(
            # Independent batch tiles -> shard grid across TCs on v7x megacore.
            dimension_semantics=("parallel",),
        ),
    )(x, w1, wmid, w6, b_head, b6)

    if D_pad != D:
        out = out[:, :D]
    return out


# ----------------------------------------------------------------------------
# Init + reference
# ----------------------------------------------------------------------------
def init_params(key, dims):
    """Deterministic PyTorch-style uniform init; weights stored (in, out)."""
    params = []
    for i in range(len(dims) - 1):
        fan_in, fan_out = dims[i], dims[i + 1]
        key, kw, kb = jax.random.split(key, 3)
        bound = 1.0 / jnp.sqrt(fan_in)
        w = jax.random.uniform(kw, (fan_in, fan_out), jnp.float32, -bound, bound)
        b = jax.random.uniform(kb, (fan_out,), jnp.float32, -bound, bound)
        params.append((w, b))
    return params


def reference_forward(x, params):
    """Reference with the same bf16-operand / f32-accumulate dots as the kernel
    (so the comparison isolates kernel structure, not bf16 rounding)."""
    n = len(params)
    relu_skip = {2, n - 1}   # no ReLU after the bottleneck or the final layer
    h = x
    for i, (w, b) in enumerate(params):
        h = jnp.dot(h.astype(jnp.bfloat16), w.astype(jnp.bfloat16),
                    preferred_element_type=jnp.float32) + b
        if i not in relu_skip:
            h = jnp.maximum(h, 0.0)
    return h


if __name__ == "__main__":
    key = jax.random.PRNGKey(0)
    B = 512      # 2 grid steps of 256 rows -> exercises pipelining / megacore
    D = 128      # train_tensor.shape[1] (input feature dimension)

    dims = [D, 64, 32, 16, 32, 64, D]
    key, kx = jax.random.split(key)
    params = init_params(key, dims)
    prepared = prepare_params(params)                 # once, outside the hot path
    x = jax.random.normal(kx, (B, D), jnp.float32)

    out = autoencoder_forward(x, prepared)
    out = jax.block_until_ready(out)

    ref = reference_forward(x, params)
    assert out.shape == (B, D)
    assert jnp.allclose(out, ref, atol=1e-4, rtol=1e-3), "mismatch vs reference"

    print("KERNEL_OK")
</pallas_src>

<mosaic_0001>
module attributes {stable_mosaic.version = 11 : i64} {
  func.func @autoencoder_kernel(%arg0: i32, %arg1: memref<256x128xf32, #tpu.memory_space<vmem>>, %arg2: memref<128x128xbf16, #tpu.memory_space<vmem>>, %arg3: memref<4x128x128xbf16, #tpu.memory_space<vmem>>, %arg4: memref<128x128xbf16, #tpu.memory_space<vmem>>, %arg5: memref<5x1x128xf32, #tpu.memory_space<vmem>>, %arg6: memref<1x128xf32, #tpu.memory_space<vmem>>, %arg7: memref<256x128xf32, #tpu.memory_space<vmem>>) attributes {dimension_semantics = [#tpu.dimension_semantics<parallel>], iteration_bounds = array<i64: 2>, scalar_prefetch = 0 : i64, scratch_operands = 0 : i64, tpu.core_type = #tpu.core_type<tc>, window_params = [{transform_indices = @transform_0, window_bounds = array<i64: 256, 128>}, {pipeline_mode = #tpu.pipeline_mode<synchronous>, transform_indices = @transform_1, window_bounds = array<i64: 128, 128>}, {pipeline_mode = #tpu.pipeline_mode<synchronous>, transform_indices = @transform_2, window_bounds = array<i64: 4, 128, 128>}, {pipeline_mode = #tpu.pipeline_mode<synchronous>, transform_indices = @transform_3, window_bounds = array<i64: 128, 128>}, {pipeline_mode = #tpu.pipeline_mode<synchronous>, transform_indices = @transform_4, window_bounds = array<i64: 5, 1, 128>}, {pipeline_mode = #tpu.pipeline_mode<synchronous>, transform_indices = @transform_5, window_bounds = array<i64: 1, 128>}, {transform_indices = @transform_6, window_bounds = array<i64: 256, 128>}]} {
    %c0 = arith.constant 0 : index
    %c0_0 = arith.constant 0 : index
    %0 = vector.load %arg1[%c0, %c0_0] : memref<256x128xf32, #tpu.memory_space<vmem>>, vector<256x128xf32>
    %1 = arith.truncf %0 : vector<256x128xf32> to vector<256x128xbf16>
    %c0_1 = arith.constant 0 : index
    %c0_2 = arith.constant 0 : index
    %2 = vector.load %arg2[%c0_1, %c0_2] : memref<128x128xbf16, #tpu.memory_space<vmem>>, vector<128x128xbf16>
    %cst = arith.constant dense<0.000000e+00> : vector<256x128xf32>
    %3 = tpu.matmul %1, %2, %cst {dimension_numbers = #tpu.dot_dimension_numbers<[1], [0], [0], [1], [0, 0, 1, 1], [], []>} : vector<256x128xbf16>, vector<128x128xbf16>, vector<256x128xf32> -> vector<256x128xf32>
    %c0_3 = arith.constant 0 : index
    %c0_4 = arith.constant 0 : index
    %c0_5 = arith.constant 0 : index
    %4 = vector.load %arg5[%c0_3, %c0_4, %c0_5] : memref<5x1x128xf32, #tpu.memory_space<vmem>>, vector<1x1x128xf32>
    %5 = vector.shape_cast %4 : vector<1x1x128xf32> to vector<1x128xf32>
    %6 = vector.broadcast %5 : vector<1x128xf32> to vector<256x128xf32>
    %7 = arith.addf %3, %6 : vector<256x128xf32>
    %cst_6 = arith.constant 0.000000e+00 : f32
    %8 = vector.broadcast %cst_6 : f32 to vector<256x128xf32>
    %9 = arith.maximumf %7, %8 : vector<256x128xf32>
    %10 = arith.truncf %9 : vector<256x128xf32> to vector<256x128xbf16>
    %c0_7 = arith.constant 0 : index
    %c0_8 = arith.constant 0 : index
    %c0_9 = arith.constant 0 : index
    %11 = vector.load %arg3[%c0_7, %c0_8, %c0_9] : memref<4x128x128xbf16, #tpu.memory_space<vmem>>, vector<1x128x128xbf16>
    %12 = vector.shape_cast %11 : vector<1x128x128xbf16> to vector<128x128xbf16>
    %cst_10 = arith.constant dense<0.000000e+00> : vector<256x128xf32>
    %13 = tpu.matmul %10, %12, %cst_10 {dimension_numbers = #tpu.dot_dimension_numbers<[1], [0], [0], [1], [0, 0, 1, 1], [], []>} : vector<256x128xbf16>, vector<128x128xbf16>, vector<256x128xf32> -> vector<256x128xf32>
    %c1 = arith.constant 1 : index
    %c0_11 = arith.constant 0 : index
    %c0_12 = arith.constant 0 : index
    %14 = vector.load %arg5[%c1, %c0_11, %c0_12] : memref<5x1x128xf32, #tpu.memory_space<vmem>>, vector<1x1x128xf32>
    %15 = vector.shape_cast %14 : vector<1x1x128xf32> to vector<1x128xf32>
    %16 = vector.broadcast %15 : vector<1x128xf32> to vector<256x128xf32>
    %17 = arith.addf %13, %16 : vector<256x128xf32>
    %cst_13 = arith.constant 0.000000e+00 : f32
    %18 = vector.broadcast %cst_13 : f32 to vector<256x128xf32>
    %19 = arith.maximumf %17, %18 : vector<256x128xf32>
    %20 = arith.truncf %19 : vector<256x128xf32> to vector<256x128xbf16>
    %c1_14 = arith.constant 1 : index
    %c0_15 = arith.constant 0 : index
    %c0_16 = arith.constant 0 : index
    %21 = vector.load %arg3[%c1_14, %c0_15, %c0_16] : memref<4x128x128xbf16, #tpu.memory_space<vmem>>, vector<1x128x128xbf16>
    %22 = vector.shape_cast %21 : vector<1x128x128xbf16> to vector<128x128xbf16>
    %cst_17 = arith.constant dense<0.000000e+00> : vector<256x128xf32>
    %23 = tpu.matmul %20, %22, %cst_17 {dimension_numbers = #tpu.dot_dimension_numbers<[1], [0], [0], [1], [0, 0, 1, 1], [], []>} : vector<256x128xbf16>, vector<128x128xbf16>, vector<256x128xf32> -> vector<256x128xf32>
    %c2 = arith.constant 2 : index
    %c0_18 = arith.constant 0 : index
    %c0_19 = arith.constant 0 : index
    %24 = vector.load %arg5[%c2, %c0_18, %c0_19] : memref<5x1x128xf32, #tpu.memory_space<vmem>>, vector<1x1x128xf32>
    %25 = vector.shape_cast %24 : vector<1x1x128xf32> to vector<1x128xf32>
    %26 = vector.broadcast %25 : vector<1x128xf32> to vector<256x128xf32>
    %27 = arith.addf %23, %26 : vector<256x128xf32>
    %28 = arith.truncf %27 : vector<256x128xf32> to vector<256x128xbf16>
    %c2_20 = arith.constant 2 : index
    %c0_21 = arith.constant 0 : index
    %c0_22 = arith.constant 0 : index
    %29 = vector.load %arg3[%c2_20, %c0_21, %c0_22] : memref<4x128x128xbf16, #tpu.memory_space<vmem>>, vector<1x128x128xbf16>
    %30 = vector.shape_cast %29 : vector<1x128x128xbf16> to vector<128x128xbf16>
    %cst_23 = arith.constant dense<0.000000e+00> : vector<256x128xf32>
    %31 = tpu.matmul %28, %30, %cst_23 {dimension_numbers = #tpu.dot_dimension_numbers<[1], [0], [0], [1], [0, 0, 1, 1], [], []>} : vector<256x128xbf16>, vector<128x128xbf16>, vector<256x128xf32> -> vector<256x128xf32>
    %c3 = arith.constant 3 : index
    %c0_24 = arith.constant 0 : index
    %c0_25 = arith.constant 0 : index
    %32 = vector.load %arg5[%c3, %c0_24, %c0_25] : memref<5x1x128xf32, #tpu.memory_space<vmem>>, vector<1x1x128xf32>
    %33 = vector.shape_cast %32 : vector<1x1x128xf32> to vector<1x128xf32>
    %34 = vector.broadcast %33 : vector<1x128xf32> to vector<256x128xf32>
    %35 = arith.addf %31, %34 : vector<256x128xf32>
    %cst_26 = arith.constant 0.000000e+00 : f32
    %36 = vector.broadcast %cst_26 : f32 to vector<256x128xf32>
    %37 = arith.maximumf %35, %36 : vector<256x128xf32>
    %38 = arith.truncf %37 : vector<256x128xf32> to vector<256x128xbf16>
    %c3_27 = arith.constant 3 : index
    %c0_28 = arith.constant 0 : index
    %c0_29 = arith.constant 0 : index
    %39 = vector.load %arg3[%c3_27, %c0_28, %c0_29] : memref<4x128x128xbf16, #tpu.memory_space<vmem>>, vector<1x128x128xbf16>
    %40 = vector.shape_cast %39 : vector<1x128x128xbf16> to vector<128x128xbf16>
    %cst_30 = arith.constant dense<0.000000e+00> : vector<256x128xf32>
    %41 = tpu.matmul %38, %40, %cst_30 {dimension_numbers = #tpu.dot_dimension_numbers<[1], [0], [0], [1], [0, 0, 1, 1], [], []>} : vector<256x128xbf16>, vector<128x128xbf16>, vector<256x128xf32> -> vector<256x128xf32>
    %c4 = arith.constant 4 : index
    %c0_31 = arith.constant 0 : index
    %c0_32 = arith.constant 0 : index
    %42 = vector.load %arg5[%c4, %c0_31, %c0_32] : memref<5x1x128xf32, #tpu.memory_space<vmem>>, vector<1x1x128xf32>
    %43 = vector.shape_cast %42 : vector<1x1x128xf32> to vector<1x128xf32>
    %44 = vector.broadcast %43 : vector<1x128xf32> to vector<256x128xf32>
    %45 = arith.addf %41, %44 : vector<256x128xf32>
    %cst_33 = arith.constant 0.000000e+00 : f32
    %46 = vector.broadcast %cst_33 : f32 to vector<256x128xf32>
    %47 = arith.maximumf %45, %46 : vector<256x128xf32>
    %48 = arith.truncf %47 : vector<256x128xf32> to vector<256x128xbf16>
    %c0_34 = arith.constant 0 : index
    %c0_35 = arith.constant 0 : index
    %49 = vector.load %arg4[%c0_34, %c0_35] : memref<128x128xbf16, #tpu.memory_space<vmem>>, vector<128x128xbf16>
    %cst_36 = arith.constant dense<0.000000e+00> : vector<256x128xf32>
    %50 = tpu.matmul %48, %49, %cst_36 {dimension_numbers = #tpu.dot_dimension_numbers<[1], [0], [0], [1], [0, 0, 1, 1], [], []>} : vector<256x128xbf16>, vector<128x128xbf16>, vector<256x128xf32> -> vector<256x128xf32>
    %c0_37 = arith.constant 0 : index
    %c0_38 = arith.constant 0 : index
    %51 = vector.load %arg6[%c0_37, %c0_38] : memref<1x128xf32, #tpu.memory_space<vmem>>, vector<1x128xf32>
    %52 = vector.broadcast %51 : vector<1x128xf32> to vector<256x128xf32>
    %53 = arith.addf %50, %52 : vector<256x128xf32>
    %c0_39 = arith.constant 0 : index
    %c0_40 = arith.constant 0 : index
    %54 = vector.load %arg7[%c0_39, %c0_40] : memref<256x128xf32, #tpu.memory_space<vmem>>, vector<256x128xf32>
    tpu.vector_store %arg7[%c0_39, %c0_40], %53 {strides = array<i32>} : memref<256x128xf32, #tpu.memory_space<vmem>>, vector<256x128xf32>,
    return
  }
  func.func @transform_0(%arg0: i32) -> (i32, i32) {
    %c0_i32 = arith.constant 0 : i32
    %c0_i32_0 = arith.constant 0 : i32
    return %arg0, %c0_i32 : i32, i32
  }
  func.func @transform_1(%arg0: i32) -> (i32, i32) {
    %c0_i32 = arith.constant 0 : i32
    %c0_i32_0 = arith.constant 0 : i32
    %c0_i32_1 = arith.constant 0 : i32
    return %c0_i32, %c0_i32_0 : i32, i32
  }
  func.func @transform_2(%arg0: i32) -> (i32, i32, i32) {
    %c0_i32 = arith.constant 0 : i32
    %c0_i32_0 = arith.constant 0 : i32
    %c0_i32_1 = arith.constant 0 : i32
    %c0_i32_2 = arith.constant 0 : i32
    return %c0_i32, %c0_i32_0, %c0_i32_1 : i32, i32, i32
  }
  func.func @transform_3(%arg0: i32) -> (i32, i32) {
    %c0_i32 = arith.constant 0 : i32
    %c0_i32_0 = arith.constant 0 : i32
    %c0_i32_1 = arith.constant 0 : i32
    return %c0_i32, %c0_i32_0 : i32, i32
  }
  func.func @transform_4(%arg0: i32) -> (i32, i32, i32) {
    %c0_i32 = arith.constant 0 : i32
    %c0_i32_0 = arith.constant 0 : i32
    %c0_i32_1 = arith.constant 0 : i32
    %c0_i32_2 = arith.constant 0 : i32
    return %c0_i32, %c0_i32_0, %c0_i32_1 : i32, i32, i32
  }
  func.func @transform_5(%arg0: i32) -> (i32, i32) {
    %c0_i32 = arith.constant 0 : i32
    %c0_i32_0 = arith.constant 0 : i32
    %c0_i32_1 = arith.constant 0 : i32
    return %c0_i32, %c0_i32_0 : i32, i32
  }
  func.func @transform_6(%arg0: i32) -> (i32, i32) {
    %c0_i32 = arith.constant 0 : i32
    %c0_i32_0 = arith.constant 0 : i32
    return %arg0, %c0_i32 : i32, i32
  }
}

</mosaic_0001>

<bundles_post_ra>
// kernel: autoencoder_forward.1
= control target key start
LH: loop header
LB: loop body
LE: loop exit
PB: predicated region body
PF: predicated region fallthrough
CT: control target
= control target key end

     0   :  { %11 = vsyncpa [#allocation3], 0  ;;  %s3484_s0 = inlined_call_operand.hbm [shape: f32[512,128], index: 0, kind: input, shape index: {}]   ;;  %s3485_s1 = inlined_call_operand.hbm [shape: bf16[128,128], index: 1, kind: input, shape index: {}]   ;;  %s3486_s2 = inlined_call_operand.hbm [shape: bf16[4,128,128], index: 2, kind: input, shape index: {}]   ;;  %s3487_s3 = inlined_call_operand.hbm [shape: bf16[128,128], index: 3, kind: input, shape index: {}]   ;;  %s3488_s4 = inlined_call_operand.vmem [shape: f32[5,1,128], index: 4, kind: input, shape index: {}]   ;;  %s3489_s5 = inlined_call_operand.vmem [shape: f32[1,128], index: 5, kind: input, shape index: {}]   ;;  %s3490_s6 = inlined_call_operand.hbm [shape: f32[512,128], index: 6, kind: output, shape index: {}]  }
   0x1   :  { %13 = vsyncpa [#allocation3 + $0x1], 0 }
   0x2   :  { %14 = vsyncpa [#allocation6], 0 }
   0x3   :  { %15 = vsyncpa [#allocation9], 0 }
   0x4   :  { %16 = vsyncpa [#allocation4], 0 }
   0x5   :  { %18 = vsyncpa [#allocation4 + $0x1], 0  ;;  %s2989_s21 = smov 0   ;;  %s2991_s22 = smov 0  }
   0x6   :  { %s2993_s23 = smov 0   ;;  %s2995_s24 = smov 0  }
   0x7 LB: > { %s3010_s25 = sadd.s32 4294967295, %s2941_s24   ;;  %s2120_s26 = sadd.s32 4294967294, %s2941_s24   ;;  %s2941_s24 = sphi %s2995_s24, %s3514_s24   ;;  %s2937_s23 = sphi %s2993_s23, %s3513_s23   ;;  %s2933_s22 = sphi %s2991_s22, %s3512_s22   ;;  %s2929_s21 = sphi %s2989_s21, %s3511_s21  }
   0x8   : > { %p44_p0 = scmp.ne.s32.totalorder %s2933_s22, %s2929_s21  ;;  %p3491_p1 = scmp.eq.s32.totalorder %s3010_s25, 0 }
   0x9   : > { %p179_p3 = scmp.eq.s32.totalorder %s2120_s26, 1  ;;  %p2121_p5 = scmp.ge.s32.totalorder %s2941_s24, 1 }
   0xa   : > { %p3019_p4 = por %p3491_p1, %p44_p0  ;;  %p186_p7 = scmp.lt.s32.totalorder %s2941_s24, 3 }
   0xb   : > { %p3024_p6 = por %p179_p3, %p44_p0  ;;  %s2943_s30 = smov [#allocation5]  }
   0xc   : > { %s3495_s27 = scalar_select %p3019_p4, 1, 0 }
   0xd   : > { %s3496_s28 = scalar_select %p3024_p6, 1, 0 }
   0xe   : > { %p3029_p8 = pnand %p2121_p5, %p186_p7  ;;  %s198_s7 = sshll.u32 %s2943_s30, 4  ;;  %s199_s7 = int_to_ptr.vmem [resolvable:$true] %s198_s7 }
   0xf   : > { %s2944_s9 = smov [#allocation7]   ;;  %s2945_s11 = smov [#allocation8]  }
  0x10   : > { %s3497_s29 = scalar_select %p3029_p8, 1, 0 }
  0x11   : > { %p2648_p9 = pneg %p3029_p8  ;;  %s211_s10 = sshll.u32 %s2944_s9, 4  ;;  %s212_s10 = int_to_ptr.vmem [resolvable:$true] %s211_s10 }
  0x12   : > { %s224_s12 = sshll.u32 %s2945_s11, 4  ;;  %s2774_s13 = scalar_lea.vmem %s199_s7, 1024  ;;  %s225_s12 = int_to_ptr.vmem [resolvable:$true] %s224_s12 }
  0x13   : > { %p3038_p11 = pnand %p2648_p9, %p3491_p1  ;;  %p2775_p13 = scmp.ne.s32.totalorder %s199_s7, %s2774_s13 }
  0x14   : > { %p2782_p5 = scmp.lt.s32.totalorder %s199_s7, %s199_s7  ;;  %p2783_p7 = scmp.lt.s32.totalorder %s2774_s13, %s2774_s13 }
  0x15   : > { %p2765_p12 = pneg %p3038_p11 }
  0x16   : > { %p2784_p9 = por %p2783_p7, %p2782_p5 }
  0x17   : > { %p2777_p0 = pnand %p2775_p13, %p2765_p12 }
  0x19   : > { %p2778_p3 = pneg %p2777_p0 }
  0x1b   : > { %p2785_p10 = pnand %p2784_p9, %p2778_p3 }
  0x1d   : > { %2788 = shalt.err (!%p2785_p10)
}
  0x1e   : > { %s2946_s14 = smov 64   ;;  %s2947_s15 = smov 4  }
  0x1f   : > { %2651 = dma.hbm_to_vmem [thread:$0]  (!%p3038_p11), %s3485_s1, 1024, %s199_s7, [#allocation6], %s2946_s14, %s2946_s14, %s2947_s15  }
  0x20   : > { %s2800_s18 = scalar_lea.vmem %s212_s10, 4096  ;;  %p2808_p2 = scmp.lt.s32.totalorder %s212_s10, %s212_s10 }
  0x21   : > { %p2801_p1 = scmp.ne.s32.totalorder %s212_s10, %s2800_s18  ;;  %p2809_p6 = scmp.lt.s32.totalorder %s2800_s18, %s2800_s18 }
  0x23   : > { %p2803_p13 = pnand %p2801_p1, %p2765_p12  ;;  %p2810_p5 = por %p2809_p6, %p2808_p2 }
  0x25   : > { %p2804_p0 = pneg %p2803_p13 }
  0x27   : > { %p2811_p3 = pnand %p2810_p5, %p2804_p0 }
  0x29   : > { %2814 = shalt.err (!%p2811_p3)
}
  0x2a   : > { %2654 = dma.hbm_to_vmem [thread:$0]  (!%p3038_p11), %s3486_s2, 4096, %s212_s10, [#allocation6], %s2946_s14, %s2946_s14, %s2947_s15  }
  0x2b   : > { %s2826_s26 = scalar_lea.vmem %s225_s12, 1024  ;;  %p2834_p9 = scmp.lt.s32.totalorder %s225_s12, %s225_s12 }
  0x2c   : > { %p2827_p10 = scmp.ne.s32.totalorder %s225_s12, %s2826_s26  ;;  %p2835_p13 = scmp.lt.s32.totalorder %s2826_s26, %s2826_s26 }
  0x2e   : > { %p2829_p7 = pnand %p2827_p10, %p2765_p12  ;;  %p2836_p4 = por %p2835_p13, %p2834_p9 }
  0x30   : > { %p2830_p1 = pneg %p2829_p7 }
  0x32   : > { %p2837_p2 = pnand %p2836_p4, %p2830_p1 }
  0x34   : > { %2840 = shalt.err (!%p2837_p2)
}
  0x35   : > { %2657 = dma.hbm_to_vmem [thread:$0]  (!%p3038_p11), %s3487_s3, 1024, %s225_s12, [#allocation9], %s2946_s14, %s2946_s14, %s2947_s15  }
  0x36   : > { %s3069_s9 = sadd.s32 1, %s2941_s24   ;;  %s31_s8 = sadd.s32 1, %s2937_s23 }
  0x37   : > { %s28_s10 = ssub.s32 %s2941_s24, %s3069_s9  ;;  %p38_p6 = scmp.ne.s32.totalorder %s2937_s23, %s2933_s22 }
  0x38   : > { %p29_p4 = scmp.eq.s32.totalorder %s28_s10, 0  ;;  %p39_p12 = scmp.eq.s32.totalorder %s2941_s24, 0 }
  0x39   : > { %p2669_p0 = scmp.lt.s32.totalorder %s2941_s24, 2  ;;  %p3499_p3 = scmp.eq.s32.totalorder %s3010_s25, 1 }
  0x3a   : > { %s3079_s11 = scalar_select %p29_p4, %s2937_s23, %s31_s8  }
  0x3b   : > { %p40_p5 = por %p39_p12, %p38_p6  ;;  %p3083_p10 = por %p3499_p3, %p38_p6 }
  0x3c   : > { %s244_s16 = sand.u32 1, %s2937_s23   ;;  %s2198_s17 = sshll.u32 %s2941_s24, 12 }
  0x3d   : > { %s3500_s13 = scalar_select %p3083_p10, 1, 0 }
  0x3e   : > { %s2126_s12 = sshll.u32 %s244_s16, 8  ;;  %s3092_s18 = scalar_lea.hbm %s3484_s0, %s2198_s17 }
  0x3f   : > { %s248_s19 = scalar_lea.vmem [#allocation2], %s2126_s12  ;;  %p3094_p11 = pnand %p2669_p0, %p40_p5 }
  0x40   : > { %s255_s20 = sshll.u32 %s248_s19, 4  ;;  %s3100_s30 = scalar_lea.sflag [#allocation3], %s244_s16  ;;  %s3098_s20 = int_to_ptr.vmem [resolvable:$true] %s255_s20 }
  0x41   : > { %s2841_s7 = scalar_lea.hbm %s3092_s18, 4096  ;;  %p2843_p1 = pneg %p3094_p11 }
  0x42   : > { %p2842_p7 = scmp.ne.s32.totalorder %s3092_s18, %s2841_s7  ;;  %s2846_s17 = scalar_lea.hbm %s3484_s0, 8192 }
  0x43   : > { %p2847_p2 = scmp.lt.s32.totalorder %s3092_s18, %s3484_s0  ;;  %p2848_p4 = scmp.lt.s32.totalorder %s2846_s17, %s2841_s7 }
  0x44   : > { %p2844_p9 = pnand %p2843_p1, %p2842_p7 }
  0x45   : > { %p2849_p6 = por %p2848_p4, %p2847_p2 }
  0x46   : > { %p2845_p13 = pneg %p2844_p9 }
  0x48   : > { %p2850_p12 = pnand %p2849_p6, %p2845_p13 }
  0x4a   : > { %2853 = shalt.err (!%p2850_p12)
}
  0x4b   : > { %s2854_s16 = scalar_lea.vmem %s3098_s20, 4096  ;;  %s2948_s15 = smov [#allocation2]  }
  0x4c   : > { %p2855_p0 = scmp.ne.s32.totalorder %s3098_s20, %s2854_s16  ;;  %s2859_s19 = sshll.u32 %s2948_s15, 4  ;;  %s2860_s19 = int_to_ptr.vmem [resolvable:$false] %s2859_s19 }
  0x4d   : > { %s2861_s10 = scalar_lea.vmem %s2860_s19, 8192  ;;  %p2862_p7 = scmp.lt.s32.totalorder %s3098_s20, %s2860_s19 }
  0x4e   : > { %p2857_p5 = pnand %p2855_p0, %p2843_p1  ;;  %p2863_p9 = scmp.lt.s32.totalorder %s2861_s10, %s2854_s16 }
  0x50   : > { %p2858_p3 = pneg %p2857_p5  ;;  %p2864_p10 = por %p2863_p9, %p2862_p7 }
  0x52   : > { %p2865_p8 = pnand %p2864_p10, %p2858_p3 }
  0x54   : > { %2868 = shalt.err (!%p2865_p8)
}
  0x55   : > { %s2949_s7 = smov 128   ;;  %s2950_s8 = smov 8  }
  0x56   : > { %2661 = dma.hbm_to_vmem [thread:$0]  (!%p3094_p11), %s3092_s18, 4096, %s3098_s20, %s3100_s30, %s2949_s7, %s2949_s7, %s2950_s8  }
  0x57   : > { %p3502_p1 = scmp.ne.s32.totalorder %s3497_s29, 0 }
  0x58   : > { %s3124_s17 = sand.u32 (!%p3502_p1), 1, %s2933_s22   ;;  %p3503_p8 = scmp.ne.s32.totalorder (!%p3502_p1), %s3495_s27, 0 }
  0x59   : > { %267 = sbr.rel (%p3502_p1) target bundleno = 1433 (0x599), region = 44  ;;  %s2130_s12 = sshll.u32 (!%p3502_p1), %s3124_s17, 8 }
  0x5a   : > { %s270_s14 = scalar_lea.sflag (!%p3502_p1), [#allocation3], %s3124_s17  ;;  %s3130_s16 = scalar_lea.vmem (!%p3502_p1), [#allocation2], %s2130_s12 }
  0x5e   : > { %2912 = dma.done.wait (%p3503_p8), %s270_s14, 4096  }
  0x5f   : > { %2914 = vsyncadd (%p3503_p8), %s270_s14, 4294963200  ;;  %p3504_p10 = scmp.eq.s32.totalorder %s3010_s25, 0 }
  0x61   : > { %2916 = dma.done.wait (%p3504_p10), [#allocation6], 5120   ;;  %p3505_p11 = pmov %p3504_p10 }
  0x62   : > { %p3506_p13 = pmov %p3504_p10 }
  0x63   : > { %2918 = vsyncadd (%p3505_p11), [#allocation6], 4294962176 }
  0x64   : > { %2920 = dma.done.wait (%p3506_p13), [#allocation9], 1024   ;;  %p3507_p2 = pmov %p3504_p10 }
  0x65   : > { %v2715_v0 = vld [vmem:[#allocation5 + $0x38] sm:$0xff]   ;;  %v2716_v1 = vld [vmem:[#allocation5 + $0x30] sm:$0xff]   ;;  %v2717_v2 = vld [vmem:[#allocation5 + $0x28] sm:$0xff]   ;;  %p3508_p6 = scmp.ne.s32.totalorder %s3500_s13, 0  ;;  %s2951_s30 = smov [#allocation10]  }
  0x66   : > { %2922 = vsyncadd (%p3507_p2), [#allocation9], 4294966272  ;;  %2344 = vmatprep.subr.bf16.mxu0 %v2715_v0  ;;  %v2718_v3 = vld [vmem:[#allocation5 + $0x20] sm:$0xff]   ;;  %v318_v5 = vld [vmem:[%s3130_s16 + $0x8] sm:$0xff]  ;;  %s2873_s15 = sshll.u32 %s2951_s30, 4  ;;  %s2874_s15 = int_to_ptr.vmem [resolvable:$false] %s2873_s15 }
  0x67   : > { %2345 = vmatpush3.bf16.msra.mxu0 %v2715_v0  ;;  %v317_v4 = vld [vmem:[%s3130_s16] sm:$0xff]  ;;  %v2719_v7 = vld [vmem:[#allocation5 + $0x18] sm:$0xff]   ;;  %v2720_v8 = vld [vmem:[#allocation5 + $0x10] sm:$0xff]   ;;  %s2875_s19 = scalar_lea.vmem %s2874_s15, 8192 }
  0x68   : > { %2346 = vmatprep.subr.bf16.mxu0 %v2716_v1  ;;  %v349_v6 = vpack.c.bf16 %v318_v5, %v317_v4  ;;  %v2721_v9 = vld [vmem:[#allocation5 + $0x8] sm:$0xff]   ;;  %v2723_v10 = vld [vmem:[#allocation7 + $0x38] sm:$0xff]   ;;  %v2724_v11 = vld [vmem:[#allocation7 + $0x30] sm:$0xff]  }
  0x69   : > { %2392 = vmatprep.subr.bf16.mxu1 %v2723_v10  ;;  %v2722_v12 = vld [vmem:[#allocation5] sm:$0xff]   ;;  %v2725_v13 = vld [vmem:[#allocation7 + $0x28] sm:$0xff]   ;;  %v319_v14 = vld [vmem:[%s3130_s16 + $0x10] sm:$0xff] }
  0x6a   : > { %2360 = vmatprep.mubr.bf16.mxu0 %v349_v6  ;;  %2393 = vmatpush3.bf16.msra.mxu1 %v2723_v10  ;;  %v320_v15 = vld [vmem:[%s3130_s16 + $0x18] sm:$0xff]  ;;  %v2726_v16 = vld [vmem:[#allocation7 + $0x20] sm:$0xff]   ;;  %v322_v18 = vld [vmem:[%s3130_s16 + $0x28] sm:$0xff] }
  0x6b   : > { %2347 = vmatpush3.bf16.msra.mxu0 %v2716_v1  ;;  %2394 = vmatprep.subr.bf16.mxu1 %v2724_v11  ;;  %v321_v17 = vld [vmem:[%s3130_s16 + $0x20] sm:$0xff]  ;;  %v2727_v19 = vld [vmem:[#allocation7 + $0x18] sm:$0xff]   ;;  %v350_v20 = vpack.c.bf16 %v320_v15, %v319_v14  ;;  %v323_v22 = vld [vmem:[%s3130_s16 + $0x30] sm:$0xff] }
  0x6c   : > { %2348 = vmatprep.subr.bf16.mxu0 %v2717_v2  ;;  %v351_v21 = vpack.c.bf16 %v322_v18, %v321_v17  ;;  %v324_v23 = vld [vmem:[%s3130_s16 + $0x38] sm:$0xff]  ;;  %v325_v24 = vld [vmem:[%s3130_s16 + $0x40] sm:$0xff]  ;;  %v326_v25 = vld [vmem:[%s3130_s16 + $0x48] sm:$0xff] }
  0x6d   : > { %v352_v26 = vpack.c.bf16 %v324_v23, %v323_v22  ;;  %v353_v27 = vpack.c.bf16 %v326_v25, %v325_v24  ;;  %v327_v28 = vld [vmem:[%s3130_s16 + $0x50] sm:$0xff]  ;;  %v328_v29 = vld [vmem:[%s3130_s16 + $0x58] sm:$0xff]  ;;  %v329_v30 = vld [vmem:[%s3130_s16 + $0x60] sm:$0xff] }
  0x6e   : > { %2395 = vmatpush3.bf16.msra.mxu1 %v2724_v11  ;;  %v330_v31 = vld [vmem:[%s3130_s16 + $0x68] sm:$0xff]  ;;  %v354_v32 = vpack.c.bf16 %v328_v29, %v327_v28  ;;  %v331_v34 = vld [vmem:[%s3130_s16 + $0x70] sm:$0xff]  ;;  %v332_v35 = vld [vmem:[%s3130_s16 + $0x78] sm:$0xff] }
  0x6f   : > { %2349 = vmatpush3.bf16.msra.mxu0 %v2717_v2  ;;  %2396 = vmatprep.subr.bf16.mxu1 %v2725_v13  ;;  %v355_v33 = vpack.c.bf16 %v330_v31, %v329_v30  ;;  %v333_v36 = vld [vmem:[%s3130_s16 + $0x80] sm:$0xff]  ;;  %v334_v37 = vld [vmem:[%s3130_s16 + $0x88] sm:$0xff]  ;;  %v356_v38 = vpack.c.bf16 %v332_v35, %v331_v34  ;;  %v335_v40 = vld [vmem:[%s3130_s16 + $0x90] sm:$0xff] }
  0x70   : > { %2350 = vmatprep.subr.bf16.mxu0 %v2718_v3  ;;  %v357_v39 = vpack.c.bf16 %v334_v37, %v333_v36  ;;  %v336_v41 = vld [vmem:[%s3130_s16 + $0x98] sm:$0xff]  ;;  %v337_v42 = vld [vmem:[%s3130_s16 + $0xa0] sm:$0xff]  ;;  %v338_v43 = vld [vmem:[%s3130_s16 + $0xa8] sm:$0xff] }
  0x71   : > { %v358_v44 = vpack.c.bf16 %v336_v41, %v335_v40  ;;  %v359_v45 = vpack.c.bf16 %v338_v43, %v337_v42  ;;  %v339_v46 = vld [vmem:[%s3130_s16 + $0xb0] sm:$0xff]  ;;  %v340_v47 = vld [vmem:[%s3130_s16 + $0xb8] sm:$0xff]  ;;  %v341_v48 = vld [vmem:[%s3130_s16 + $0xc0] sm:$0xff] }
  0x72   : > { %2397 = vmatpush3.bf16.msra.mxu1 %v2725_v13  ;;  %v342_v49 = vld [vmem:[%s3130_s16 + $0xc8] sm:$0xff]  ;;  %v360_v50 = vpack.c.bf16 %v340_v47, %v339_v46  ;;  %v343_v52 = vld [vmem:[%s3130_s16 + $0xd0] sm:$0xff]  ;;  %v344_v53 = vld [vmem:[%s3130_s16 + $0xd8] sm:$0xff] }
  0x73   : > { %2351 = vmatpush3.bf16.msra.mxu0 %v2718_v3  ;;  %2398 = vmatprep.subr.bf16.mxu1 %v2726_v16  ;;  %v361_v51 = vpack.c.bf16 %v342_v49, %v341_v48  ;;  %v345_v54 = vld [vmem:[%s3130_s16 + $0xe0] sm:$0xff]  ;;  %v346_v55 = vld [vmem:[%s3130_s16 + $0xe8] sm:$0xff]  ;;  %v362_v56 = vpack.c.bf16 %v344_v53, %v343_v52  ;;  %v347_v58 = vld [vmem:[%s3130_s16 + $0xf0] sm:$0xff] }
  0x74   : > { %2352 = vmatprep.subr.bf16.mxu0 %v2719_v7  ;;  %v363_v57 = vpack.c.bf16 %v346_v55, %v345_v54  ;;  %v348_v59 = vld [vmem:[%s3130_s16 + $0xf8] sm:$0xff]  ;;  %v2728_v61 = vld [vmem:[#allocation7 + $0x10] sm:$0xff]   ;;  %v2729_v62 = vld [vmem:[#allocation7 + $0x8] sm:$0xff]   ;;  %s3369_s16 = scalar_lea.vmem [#allocation10], %s2130_s12  ;;  %s2199_s12 = sshll.u32 %s3010_s25, 12 }
  0x75   : > { %v364_v60 = vpack.c.bf16 %v348_v59, %v347_v58  ;;  %v2730_v63 = vld [vmem:[#allocation7] sm:$0xff]   ;;  %v2731_v0 = vld [vmem:[#allocation7 + $0x78] sm:$0xff]   ;;  %v2732_v1 = vld [vmem:[#allocation7 + $0x70] sm:$0xff]   ;;  %s2018_s27 = sshll.u32 %s3369_s16, 4  ;;  %s3436_s20 = scalar_lea.hbm %s3490_s6, %s2199_s12  ;;  %s3438_s27 = int_to_ptr.vmem [resolvable:$true] %s2018_s27 }
  0x76   : > { %2399 = vmatpush3.bf16.msra.mxu1 %v2726_v16  ;;  %v2733_v2 = vld [vmem:[#allocation7 + $0x68] sm:$0xff]   ;;  %v2734_v3 = vld [vmem:[#allocation7 + $0x60] sm:$0xff]   ;;  %v2735_v4 = vld [vmem:[#allocation7 + $0x58] sm:$0xff]   ;;  %s2005_s25 = scalar_lea.sflag [#allocation4], %s3124_s17  ;;  %s2869_s26 = scalar_lea.vmem %s3438_s27, 4096 }
  0x77   : > { %2353 = vmatpush3.bf16.msra.mxu0 %v2719_v7  ;;  %2400 = vmatprep.subr.bf16.mxu1 %v2727_v19  ;;  %v2736_v5 = vld [vmem:[#allocation7 + $0x50] sm:$0xff]   ;;  %v2737_v6 = vld [vmem:[#allocation7 + $0x48] sm:$0xff]   ;;  %p2870_p4 = scmp.ne.s32.totalorder %s3438_s27, %s2869_s26  ;;  %p2876_p5 = scmp.lt.s32.totalorder %s3438_s27, %s2874_s15 }
  0x78   : > { %2354 = vmatprep.subr.bf16.mxu0 %v2720_v8  ;;  %p2877_p3 = scmp.lt.s32.totalorder %s2875_s19, %s2869_s26 }
  0x79   : > { %p2871_p12 = pnand %p2870_p4, %p3508_p6 }
  0x7a   : > { %2401 = vmatpush3.bf16.msra.mxu1 %v2727_v19  ;;  %p2878_p7 = por %p2877_p3, %p2876_p5 }
  0x7b   : > { %2355 = vmatpush3.bf16.msra.mxu0 %v2720_v8  ;;  %2402 = vmatprep.subr.bf16.mxu1 %v2728_v61  ;;  %p2872_p0 = pneg %p2871_p12 }
  0x7c   : > { %2356 = vmatprep.subr.bf16.mxu0 %v2721_v9 }
  0x7d   : > { %p2879_p9 = pnand %p2878_p7, %p2872_p0 }
  0x7e   : > { %2403 = vmatpush3.bf16.msra.mxu1 %v2728_v61 }
  0x7f   : > { %2357 = vmatpush3.bf16.msra.mxu0 %v2721_v9  ;;  %2404 = vmatprep.subr.bf16.mxu1 %v2729_v62  ;;  %v3179_v9 = vld [vmem:[%s3488_s4] ss:$0 sm:$0xff] }
  0x80   : > { %2358 = vmatprep.subr.bf16.mxu0 %v2722_v12 }
  0x82   : > { %2405 = vmatpush3.bf16.msra.mxu1 %v2729_v62 }
  0x83   : > { %2359 = vmatpush3.bf16.msra.mxu0 %v2722_v12  ;;  %2406 = vmatprep.subr.bf16.mxu1 %v2730_v63 }
  0x84   : > { %2440 = vmatprep.subr.bf16.mxu0 %v2731_v0 }
  0x86   : > { %2361 = vmatmul.mubr.bf16.vlgmr.msra.gmra.mxu0 %v350_v20  ;;  %2407 = vmatpush3.bf16.msra.mxu1 %v2730_v63 }
  0x87   : > { %2364 = vmatprep.mubr.bf16.mxu0 %v351_v21  ;;  %2441 = vmatpush3.bf16.msra.mxu0 %v2731_v0 }
  0x88   : > { %2442 = vmatprep.subr.bf16.mxu0 %v2732_v1 }
  0x8b   : > { %2443 = vmatpush3.bf16.msra.mxu0 %v2732_v1 }
  0x8c   : > { %2444 = vmatprep.subr.bf16.mxu0 %v2733_v2 }
  0x8e   : > { %2365 = vmatmul.mubr.bf16.gmra.mxu0 %v352_v26 }
  0x8f   : > { %2368 = vmatprep.mubr.bf16.mxu0 %v353_v27  ;;  %2445 = vmatpush3.bf16.msra.mxu0 %v2733_v2 }
  0x90   : > { %2446 = vmatprep.subr.bf16.mxu0 %v2734_v3 }
  0x93   : > { %2447 = vmatpush3.bf16.msra.mxu0 %v2734_v3 }
  0x94   : > { %2448 = vmatprep.subr.bf16.mxu0 %v2735_v4 }
  0x96   : > { %2369 = vmatmul.mubr.bf16.gmra.mxu0 %v354_v32 }
  0x97   : > { %2372 = vmatprep.mubr.bf16.mxu0 %v355_v33  ;;  %2449 = vmatpush3.bf16.msra.mxu0 %v2735_v4 }
  0x98   : > { %2450 = vmatprep.subr.bf16.mxu0 %v2736_v5 }
  0x9b   : > { %2451 = vmatpush3.bf16.msra.mxu0 %v2736_v5 }
  0x9c   : > { %2452 = vmatprep.subr.bf16.mxu0 %v2737_v6 }
  0x9e   : > { %2373 = vmatmul.mubr.bf16.gmra.mxu0 %v356_v38 }
  0x9f   : > { %2376 = vmatprep.mubr.bf16.mxu0 %v357_v39  ;;  %2453 = vmatpush3.bf16.msra.mxu0 %v2737_v6 }
  0xa6   : > { %2377 = vmatmul.mubr.bf16.gmra.mxu0 %v358_v44 }
  0xa7   : > { %2380 = vmatprep.mubr.bf16.mxu0 %v359_v45 }
  0xae   : > { %2381 = vmatmul.mubr.bf16.gmra.mxu0 %v360_v50 }
  0xaf   : > { %2384 = vmatprep.mubr.bf16.mxu0 %v361_v51 }
  0xb6   : > { %2385 = vmatmul.mubr.bf16.gmra.mxu0 %v362_v56 }
  0xb7   : > { %2388 = vmatprep.mubr.bf16.mxu0 %v363_v57 }
  0xbe   : > { %2389 = vmatmul.mubr.bf16.gmra.mxu0 %v364_v60 }
 0x146   : > { %v2362_v7 = vpop.f32.mrf.mxu0 }
 0x147   : > { %v479_v13 = vadd.f32 %v2362_v7, %v3179_v9 }
 0x148   : > { %v470_v8 = vpop.f32.mrf.mxu0 }
 0x149   : > { %v471_v11 = vadd.f32 %v3179_v9, %v470_v8  ;;  %v599_v20 = vmax.f32 %v479_v13, 0.0 }
 0x14a   : > { %v2363_v10 = vpop.f32.mrf.mxu0 }
 0x14b   : > { %v482_v12 = vadd.f32 %v2363_v10, %v3179_v9  ;;  %v597_v18 = vmax.f32 %v471_v11, 0.0 }
 0x14c   : > { %v473_v14 = vpop.f32.mrf.mxu0 }
 0x14d   : > { %v474_v15 = vadd.f32 %v3179_v9, %v473_v14  ;;  %v600_v16 = vmax.f32 %v482_v12, 0.0 }
 0x14e   : > { %v2366_v17 = vpop.f32.mrf.mxu0 }
 0x14f   : > { %v598_v19 = vmax.f32 %v474_v15, 0.0  ;;  %v630_v23 = vpack.c.bf16 %v600_v16, %v599_v20  ;;  %v495_v27 = vadd.f32 %v2366_v17, %v3179_v9 }
 0x150   : > { %v486_v21 = vpop.f32.mrf.mxu0 }
 0x151   : > { %v629_v22 = vpack.c.bf16 %v598_v19, %v597_v18  ;;  %v487_v25 = vadd.f32 %v3179_v9, %v486_v21  ;;  %v603_v34 = vmax.f32 %v495_v27, 0.0 }
 0x152   : > { %v2367_v24 = vpop.f32.mrf.mxu0 }
 0x153   : > { %v498_v26 = vadd.f32 %v2367_v24, %v3179_v9  ;;  %2408 = vmatprep.mubr.bf16.mxu1 %v629_v22  ;;  %v601_v32 = vmax.f32 %v487_v25, 0.0 }
 0x154   : > { %v489_v28 = vpop.f32.mrf.mxu0  ;;  %2409 = vmatmul.mubr.bf16.vlgmr.msra.gmra.mxu1 %v630_v23 }
 0x155   : > { %v490_v29 = vadd.f32 %v3179_v9, %v489_v28  ;;  %v604_v30 = vmax.f32 %v498_v26, 0.0 }
 0x156   : > { %v2370_v31 = vpop.f32.mrf.mxu0 }
 0x157   : > { %v602_v33 = vmax.f32 %v490_v29, 0.0  ;;  %v632_v37 = vpack.c.bf16 %v604_v30, %v603_v34  ;;  %v511_v41 = vadd.f32 %v2370_v31, %v3179_v9 }
 0x158   : > { %v502_v35 = vpop.f32.mrf.mxu0 }
 0x159   : > { %v631_v36 = vpack.c.bf16 %v602_v33, %v601_v32  ;;  %v503_v39 = vadd.f32 %v3179_v9, %v502_v35  ;;  %v607_v48 = vmax.f32 %v511_v41, 0.0 }
 0x15a   : > { %v2371_v38 = vpop.f32.mrf.mxu0 }
 0x15b   : > { %v514_v40 = vadd.f32 %v2371_v38, %v3179_v9  ;;  %2412 = vmatprep.mubr.bf16.mxu1 %v631_v36  ;;  %v605_v46 = vmax.f32 %v503_v39, 0.0 }
 0x15c   : > { %v505_v42 = vpop.f32.mrf.mxu0  ;;  %2413 = vmatmul.mubr.bf16.gmra.mxu1 %v632_v37 }
 0x15d   : > { %v506_v43 = vadd.f32 %v3179_v9, %v505_v42  ;;  %v608_v44 = vmax.f32 %v514_v40, 0.0 }
 0x15e   : > { %v2374_v45 = vpop.f32.mrf.mxu0 }
 0x15f   : > { %v606_v47 = vmax.f32 %v506_v43, 0.0  ;;  %v634_v51 = vpack.c.bf16 %v608_v44, %v607_v48  ;;  %v527_v55 = vadd.f32 %v2374_v45, %v3179_v9 }
 0x160   : > { %v518_v49 = vpop.f32.mrf.mxu0 }
 0x161   : > { %v633_v50 = vpack.c.bf16 %v606_v47, %v605_v46  ;;  %v519_v53 = vadd.f32 %v3179_v9, %v518_v49  ;;  %v611_v62 = vmax.f32 %v527_v55, 0.0 }
 0x162   : > { %v2375_v52 = vpop.f32.mrf.mxu0 }
 0x163   : > { %v530_v54 = vadd.f32 %v2375_v52, %v3179_v9  ;;  %2416 = vmatprep.mubr.bf16.mxu1 %v633_v50  ;;  %v609_v60 = vmax.f32 %v519_v53, 0.0 }
 0x164   : > { %v521_v56 = vpop.f32.mrf.mxu0  ;;  %2417 = vmatmul.mubr.bf16.gmra.mxu1 %v634_v51 }
 0x165   : > { %v522_v57 = vadd.f32 %v3179_v9, %v521_v56  ;;  %v612_v58 = vmax.f32 %v530_v54, 0.0 }
 0x166   : > { %v2378_v59 = vpop.f32.mrf.mxu0 }
 0x167   : > { %v610_v61 = vmax.f32 %v522_v57, 0.0  ;;  %v636_v1 = vpack.c.bf16 %v612_v58, %v611_v62  ;;  %v543_v5 = vadd.f32 %v2378_v59, %v3179_v9  ;;  %v2738_v57 = vld [vmem:[#allocation7 + $0x40] sm:$0xff]   ;;  %v2739_v58 = vld [vmem:[#allocation7 + $0xb8] sm:$0xff]   ;;  %v2740_v59 = vld [vmem:[#allocation7 + $0xb0] sm:$0xff]  }
 0x168   : > { %v534_v63 = vpop.f32.mrf.mxu0  ;;  %2454 = vmatprep.subr.bf16.mxu0 %v2738_v57  ;;  %2488 = vmatprep.subr.bf16.mxu1 %v2739_v58  ;;  %v2744_v62 = vld [vmem:[#allocation7 + $0x90] sm:$0xff]  }
 0x169   : > { %v635_v0 = vpack.c.bf16 %v610_v61, %v609_v60  ;;  %v535_v3 = vadd.f32 %v3179_v9, %v534_v63  ;;  %v615_v13 = vmax.f32 %v543_v5, 0.0  ;;  %2455 = vmatpush3.bf16.msra.mxu0 %v2738_v57  ;;  %2489 = vmatpush3.bf16.msra.mxu1 %v2739_v58  ;;  %v2741_v60 = vld [vmem:[#allocation7 + $0xa8] sm:$0xff]   ;;  %v2743_v61 = vld [vmem:[#allocation7 + $0x98] sm:$0xff]  }
 0x16a   : > { %v2379_v2 = vpop.f32.mrf.mxu0  ;;  %2490 = vmatprep.subr.bf16.mxu1 %v2740_v59  ;;  %v2745_v63 = vld [vmem:[#allocation7 + $0x88] sm:$0xff]  }
 0x16b   : > { %v546_v4 = vadd.f32 %v2379_v2, %v3179_v9  ;;  %2420 = vmatprep.mubr.bf16.mxu1 %v635_v0  ;;  %v613_v11 = vmax.f32 %v535_v3, 0.0  ;;  %v3216_v2 = vld [vmem:[%s3488_s4 + $0x1] ss:$0 sm:$0xff] }
 0x16c   : > { %v537_v6 = vpop.f32.mrf.mxu0  ;;  %2421 = vmatmul.mubr.bf16.gmra.mxu1 %v636_v1 }
 0x16d   : > { %v538_v7 = vadd.f32 %v3179_v9, %v537_v6  ;;  %v616_v8 = vmax.f32 %v546_v4, 0.0  ;;  %2491 = vmatpush3.bf16.msra.mxu1 %v2740_v59 }
 0x16e   : > { %v2382_v10 = vpop.f32.mrf.mxu0  ;;  %2492 = vmatprep.subr.bf16.mxu1 %v2741_v60 }
 0x16f   : > { %v614_v12 = vmax.f32 %v538_v7, 0.0  ;;  %v638_v16 = vpack.c.bf16 %v616_v8, %v615_v13  ;;  %v559_v20 = vadd.f32 %v2382_v10, %v3179_v9 }
 0x170   : > { %v550_v14 = vpop.f32.mrf.mxu0 }
 0x171   : > { %v637_v15 = vpack.c.bf16 %v614_v12, %v613_v11  ;;  %v551_v18 = vadd.f32 %v3179_v9, %v550_v14  ;;  %v619_v27 = vmax.f32 %v559_v20, 0.0  ;;  %2493 = vmatpush3.bf16.msra.mxu1 %v2741_v60 }
 0x172   : > { %v2383_v17 = vpop.f32.mrf.mxu0 }
 0x173   : > { %v562_v19 = vadd.f32 %v2383_v17, %v3179_v9  ;;  %2424 = vmatprep.mubr.bf16.mxu1 %v637_v15  ;;  %v617_v25 = vmax.f32 %v551_v18, 0.0 }
 0x174   : > { %v553_v21 = vpop.f32.mrf.mxu0  ;;  %2425 = vmatmul.mubr.bf16.gmra.mxu1 %v638_v16 }
 0x175   : > { %v554_v22 = vadd.f32 %v3179_v9, %v553_v21  ;;  %v620_v23 = vmax.f32 %v562_v19, 0.0 }
 0x176   : > { %v2386_v24 = vpop.f32.mrf.mxu0 }
 0x177   : > { %v618_v26 = vmax.f32 %v554_v22, 0.0  ;;  %v640_v30 = vpack.c.bf16 %v620_v23, %v619_v27  ;;  %v575_v34 = vadd.f32 %v2386_v24, %v3179_v9 }
 0x178   : > { %v566_v28 = vpop.f32.mrf.mxu0 }
 0x179   : > { %v639_v29 = vpack.c.bf16 %v618_v26, %v617_v25  ;;  %v567_v32 = vadd.f32 %v3179_v9, %v566_v28  ;;  %v623_v41 = vmax.f32 %v575_v34, 0.0 }
 0x17a   : > { %v2387_v31 = vpop.f32.mrf.mxu0 }
 0x17b   : > { %v578_v33 = vadd.f32 %v2387_v31, %v3179_v9  ;;  %2428 = vmatprep.mubr.bf16.mxu1 %v639_v29  ;;  %v621_v39 = vmax.f32 %v567_v32, 0.0 }
 0x17c   : > { %v569_v35 = vpop.f32.mrf.mxu0  ;;  %2429 = vmatmul.mubr.bf16.gmra.mxu1 %v640_v30 }
 0x17d   : > { %v570_v36 = vadd.f32 %v3179_v9, %v569_v35  ;;  %v624_v37 = vmax.f32 %v578_v33, 0.0 }
 0x17e   : > { %v2390_v38 = vpop.f32.mrf.mxu0 }
 0x17f   : > { %v622_v40 = vmax.f32 %v570_v36, 0.0  ;;  %v642_v44 = vpack.c.bf16 %v624_v37, %v623_v41  ;;  %v591_v48 = vadd.f32 %v2390_v38, %v3179_v9 }
 0x180   : > { %v582_v42 = vpop.f32.mrf.mxu0 }
 0x181   : > { %v641_v43 = vpack.c.bf16 %v622_v40, %v621_v39  ;;  %v583_v46 = vadd.f32 %v3179_v9, %v582_v42  ;;  %v627_v54 = vmax.f32 %v591_v48, 0.0 }
 0x182   : > { %v2391_v45 = vpop.f32.mrf.mxu0 }
 0x183   : > { %v594_v47 = vadd.f32 %v2391_v45, %v3179_v9  ;;  %2432 = vmatprep.mubr.bf16.mxu1 %v641_v43  ;;  %v625_v52 = vmax.f32 %v583_v46, 0.0 }
 0x184   : > { %v585_v49 = vpop.f32.mrf.mxu0  ;;  %2433 = vmatmul.mubr.bf16.gmra.mxu1 %v642_v44 }
 0x185   : > { %v586_v50 = vadd.f32 %v3179_v9, %v585_v49  ;;  %v628_v51 = vmax.f32 %v594_v47, 0.0  ;;  %v2742_v9 = vld [vmem:[#allocation7 + $0xa0] sm:$0xff]  }
 0x186   : > { %2494 = vmatprep.subr.bf16.mxu1 %v2742_v9 }
 0x187   : > { %v626_v53 = vmax.f32 %v586_v50, 0.0  ;;  %v644_v56 = vpack.c.bf16 %v628_v51, %v627_v54  ;;  %2495 = vmatpush3.bf16.msra.mxu1 %v2742_v9 }
 0x188   : > { %2496 = vmatprep.subr.bf16.mxu1 %v2743_v61 }
 0x189   : > { %v643_v55 = vpack.c.bf16 %v626_v53, %v625_v52 }
 0x18b   : > { %2436 = vmatprep.mubr.bf16.mxu1 %v643_v55  ;;  %2497 = vmatpush3.bf16.msra.mxu1 %v2743_v61 }
 0x18c   : > { %2437 = vmatmul.mubr.bf16.gmra.mxu1 %v644_v56  ;;  %2498 = vmatprep.subr.bf16.mxu1 %v2744_v62 }
 0x18f   : > { %2499 = vmatpush3.bf16.msra.mxu1 %v2744_v62 }
 0x190   : > { %2500 = vmatprep.subr.bf16.mxu1 %v2745_v63 }
 0x193   : > { %2501 = vmatpush3.bf16.msra.mxu1 %v2745_v63 }
 0x214   : > { %v2410_v0 = vpop.f32.mrf.mxu1 }
 0x215   : > { %v760_v6 = vadd.f32 %v2410_v0, %v3216_v2 }
 0x216   : > { %v751_v1 = vpop.f32.mrf.mxu1 }
 0x217   : > { %v752_v4 = vadd.f32 %v3216_v2, %v751_v1  ;;  %v880_v14 = vmax.f32 %v760_v6, 0.0 }
 0x218   : > { %v2411_v3 = vpop.f32.mrf.mxu1 }
 0x219   : > { %v763_v5 = vadd.f32 %v2411_v3, %v3216_v2  ;;  %v878_v12 = vmax.f32 %v752_v4, 0.0 }
 0x21a   : > { %v754_v7 = vpop.f32.mrf.mxu1 }
 0x21b   : > { %v755_v8 = vadd.f32 %v3216_v2, %v754_v7  ;;  %v881_v10 = vmax.f32 %v763_v5, 0.0 }
 0x21c   : > { %v2414_v11 = vpop.f32.mrf.mxu1 }
 0x21d   : > { %v879_v13 = vmax.f32 %v755_v8, 0.0  ;;  %v911_v17 = vpack.c.bf16 %v881_v10, %v880_v14  ;;  %v776_v21 = vadd.f32 %v2414_v11, %v3216_v2 }
 0x21e   : > { %v767_v15 = vpop.f32.mrf.mxu1 }
 0x21f   : > { %v910_v16 = vpack.c.bf16 %v879_v13, %v878_v12  ;;  %v768_v19 = vadd.f32 %v3216_v2, %v767_v15  ;;  %v884_v28 = vmax.f32 %v776_v21, 0.0 }
 0x220   : > { %v2415_v18 = vpop.f32.mrf.mxu1 }
 0x221   : > { %v779_v20 = vadd.f32 %v2415_v18, %v3216_v2  ;;  %2456 = vmatprep.mubr.bf16.mxu0 %v910_v16  ;;  %v882_v26 = vmax.f32 %v768_v19, 0.0 }
 0x222   : > { %v770_v22 = vpop.f32.mrf.mxu1  ;;  %2457 = vmatmul.mubr.bf16.vlgmr.msra.gmra.mxu0 %v911_v17 }
 0x223   : > { %v771_v23 = vadd.f32 %v3216_v2, %v770_v22  ;;  %v885_v24 = vmax.f32 %v779_v20, 0.0 }
 0x224   : > { %v2418_v25 = vpop.f32.mrf.mxu1 }
 0x225   : > { %v883_v27 = vmax.f32 %v771_v23, 0.0  ;;  %v913_v31 = vpack.c.bf16 %v885_v24, %v884_v28  ;;  %v792_v35 = vadd.f32 %v2418_v25, %v3216_v2 }
 0x226   : > { %v783_v29 = vpop.f32.mrf.mxu1 }
 0x227   : > { %v912_v30 = vpack.c.bf16 %v883_v27, %v882_v26  ;;  %v784_v33 = vadd.f32 %v3216_v2, %v783_v29  ;;  %v888_v42 = vmax.f32 %v792_v35, 0.0 }
 0x228   : > { %v2419_v32 = vpop.f32.mrf.mxu1 }
 0x229   : > { %v795_v34 = vadd.f32 %v2419_v32, %v3216_v2  ;;  %2460 = vmatprep.mubr.bf16.mxu0 %v912_v30  ;;  %v886_v40 = vmax.f32 %v784_v33, 0.0 }
 0x22a   : > { %v786_v36 = vpop.f32.mrf.mxu1  ;;  %2461 = vmatmul.mubr.bf16.gmra.mxu0 %v913_v31 }
 0x22b   : > { %v787_v37 = vadd.f32 %v3216_v2, %v786_v36  ;;  %v889_v38 = vmax.f32 %v795_v34, 0.0 }
 0x22c   : > { %v2422_v39 = vpop.f32.mrf.mxu1 }
 0x22d   : > { %v887_v41 = vmax.f32 %v787_v37, 0.0  ;;  %v915_v45 = vpack.c.bf16 %v889_v38, %v888_v42  ;;  %v808_v49 = vadd.f32 %v2422_v39, %v3216_v2 }
 0x22e   : > { %v799_v43 = vpop.f32.mrf.mxu1 }
 0x22f   : > { %v914_v44 = vpack.c.bf16 %v887_v41, %v886_v40  ;;  %v800_v47 = vadd.f32 %v3216_v2, %v799_v43  ;;  %v892_v56 = vmax.f32 %v808_v49, 0.0 }
 0x230   : > { %v2423_v46 = vpop.f32.mrf.mxu1 }
 0x231   : > { %v811_v48 = vadd.f32 %v2423_v46, %v3216_v2  ;;  %2464 = vmatprep.mubr.bf16.mxu0 %v914_v44  ;;  %v890_v54 = vmax.f32 %v800_v47, 0.0 }
 0x232   : > { %v802_v50 = vpop.f32.mrf.mxu1  ;;  %2465 = vmatmul.mubr.bf16.gmra.mxu0 %v915_v45 }
 0x233   : > { %v803_v51 = vadd.f32 %v3216_v2, %v802_v50  ;;  %v893_v52 = vmax.f32 %v811_v48, 0.0 }
 0x234   : > { %v2426_v53 = vpop.f32.mrf.mxu1 }
 0x235   : > { %v891_v55 = vmax.f32 %v803_v51, 0.0  ;;  %v917_v59 = vpack.c.bf16 %v893_v52, %v892_v56  ;;  %v824_v62 = vadd.f32 %v2426_v53, %v3216_v2  ;;  %v2746_v51 = vld [vmem:[#allocation7 + $0x80] sm:$0xff]   ;;  %v2747_v52 = vld [vmem:[#allocation7 + $0xf8] sm:$0xff]   ;;  %v2748_v53 = vld [vmem:[#allocation7 + $0xf0] sm:$0xff]  }
 0x236   : > { %v815_v57 = vpop.f32.mrf.mxu1  ;;  %2502 = vmatprep.subr.bf16.mxu1 %v2746_v51  ;;  %2536 = vmatprep.subr.bf16.mxu0 %v2747_v52  ;;  %v2752_v56 = vld [vmem:[#allocation7 + $0xd0] sm:$0xff]  }
 0x237   : > { %v916_v58 = vpack.c.bf16 %v891_v55, %v890_v54  ;;  %v816_v9 = vadd.f32 %v3216_v2, %v815_v57  ;;  %v896_v6 = vmax.f32 %v824_v62, 0.0  ;;  %2503 = vmatpush3.bf16.msra.mxu1 %v2746_v51  ;;  %2537 = vmatpush3.bf16.msra.mxu0 %v2747_v52  ;;  %v2749_v54 = vld [vmem:[#allocation7 + $0xe8] sm:$0xff]   ;;  %v2751_v55 = vld [vmem:[#allocation7 + $0xd8] sm:$0xff]  }
 0x238   : > { %v2427_v60 = vpop.f32.mrf.mxu1  ;;  %2538 = vmatprep.subr.bf16.mxu0 %v2748_v53  ;;  %v2753_v57 = vld [vmem:[#allocation7 + $0xc8] sm:$0xff]  }
 0x239   : > { %v827_v61 = vadd.f32 %v2427_v60, %v3216_v2  ;;  %2468 = vmatprep.mubr.bf16.mxu0 %v916_v58  ;;  %v894_v4 = vmax.f32 %v816_v9, 0.0  ;;  %v3253_v9 = vld [vmem:[%s3488_s4 + $0x2] ss:$0 sm:$0xff] }
 0x23a   : > { %v818_v63 = vpop.f32.mrf.mxu1  ;;  %2469 = vmatmul.mubr.bf16.gmra.mxu0 %v917_v59 }
 0x23b   : > { %v819_v0 = vadd.f32 %v3216_v2, %v818_v63  ;;  %v897_v1 = vmax.f32 %v827_v61, 0.0  ;;  %2539 = vmatpush3.bf16.msra.mxu0 %v2748_v53 }
 0x23c   : > { %v2430_v3 = vpop.f32.mrf.mxu1  ;;  %2540 = vmatprep.subr.bf16.mxu0 %v2749_v54 }
 0x23d   : > { %v895_v5 = vmax.f32 %v819_v0, 0.0  ;;  %v919_v10 = vpack.c.bf16 %v897_v1, %v896_v6  ;;  %v840_v14 = vadd.f32 %v2430_v3, %v3216_v2 }
 0x23e   : > { %v831_v7 = vpop.f32.mrf.mxu1 }
 0x23f   : > { %v918_v8 = vpack.c.bf16 %v895_v5, %v894_v4  ;;  %v832_v12 = vadd.f32 %v3216_v2, %v831_v7  ;;  %v900_v21 = vmax.f32 %v840_v14, 0.0  ;;  %2541 = vmatpush3.bf16.msra.mxu0 %v2749_v54 }
 0x240   : > { %v2431_v11 = vpop.f32.mrf.mxu1 }
 0x241   : > { %v843_v13 = vadd.f32 %v2431_v11, %v3216_v2  ;;  %2472 = vmatprep.mubr.bf16.mxu0 %v918_v8  ;;  %v898_v19 = vmax.f32 %v832_v12, 0.0 }
 0x242   : > { %v834_v15 = vpop.f32.mrf.mxu1  ;;  %2473 = vmatmul.mubr.bf16.gmra.mxu0 %v919_v10 }
 0x243   : > { %v835_v16 = vadd.f32 %v3216_v2, %v834_v15  ;;  %v901_v17 = vmax.f32 %v843_v13, 0.0 }
 0x244   : > { %v2434_v18 = vpop.f32.mrf.mxu1 }
 0x245   : > { %v899_v20 = vmax.f32 %v835_v16, 0.0  ;;  %v921_v24 = vpack.c.bf16 %v901_v17, %v900_v21  ;;  %v856_v28 = vadd.f32 %v2434_v18, %v3216_v2 }
 0x246   : > { %v847_v22 = vpop.f32.mrf.mxu1 }
 0x247   : > { %v920_v23 = vpack.c.bf16 %v899_v20, %v898_v19  ;;  %v848_v26 = vadd.f32 %v3216_v2, %v847_v22  ;;  %v904_v35 = vmax.f32 %v856_v28, 0.0 }
 0x248   : > { %v2435_v25 = vpop.f32.mrf.mxu1 }
 0x249   : > { %v859_v27 = vadd.f32 %v2435_v25, %v3216_v2  ;;  %2476 = vmatprep.mubr.bf16.mxu0 %v920_v23  ;;  %v902_v33 = vmax.f32 %v848_v26, 0.0 }
 0x24a   : > { %v850_v29 = vpop.f32.mrf.mxu1  ;;  %2477 = vmatmul.mubr.bf16.gmra.mxu0 %v921_v24 }
 0x24b   : > { %v851_v30 = vadd.f32 %v3216_v2, %v850_v29  ;;  %v905_v31 = vmax.f32 %v859_v27, 0.0 }
 0x24c   : > { %v2438_v32 = vpop.f32.mrf.mxu1 }
 0x24d   : > { %v903_v34 = vmax.f32 %v851_v30, 0.0  ;;  %v923_v38 = vpack.c.bf16 %v905_v31, %v904_v35  ;;  %v872_v42 = vadd.f32 %v2438_v32, %v3216_v2 }
 0x24e   : > { %v863_v36 = vpop.f32.mrf.mxu1 }
 0x24f   : > { %v922_v37 = vpack.c.bf16 %v903_v34, %v902_v33  ;;  %v864_v40 = vadd.f32 %v3216_v2, %v863_v36  ;;  %v908_v48 = vmax.f32 %v872_v42, 0.0 }
 0x250   : > { %v2439_v39 = vpop.f32.mrf.mxu1 }
 0x251   : > { %v875_v41 = vadd.f32 %v2439_v39, %v3216_v2  ;;  %2480 = vmatprep.mubr.bf16.mxu0 %v922_v37  ;;  %v906_v46 = vmax.f32 %v864_v40, 0.0 }
 0x252   : > { %v866_v43 = vpop.f32.mrf.mxu1  ;;  %2481 = vmatmul.mubr.bf16.gmra.mxu0 %v923_v38 }
 0x253   : > { %v867_v44 = vadd.f32 %v3216_v2, %v866_v43  ;;  %v909_v45 = vmax.f32 %v875_v41, 0.0  ;;  %v2750_v2 = vld [vmem:[#allocation7 + $0xe0] sm:$0xff]  }
 0x254   : > { %2542 = vmatprep.subr.bf16.mxu0 %v2750_v2 }
 0x255   : > { %v907_v47 = vmax.f32 %v867_v44, 0.0  ;;  %v925_v50 = vpack.c.bf16 %v909_v45, %v908_v48  ;;  %2543 = vmatpush3.bf16.msra.mxu0 %v2750_v2 }
 0x256   : > { %2544 = vmatprep.subr.bf16.mxu0 %v2751_v55 }
 0x257   : > { %v924_v49 = vpack.c.bf16 %v907_v47, %v906_v46 }
 0x259   : > { %2484 = vmatprep.mubr.bf16.mxu0 %v924_v49  ;;  %2545 = vmatpush3.bf16.msra.mxu0 %v2751_v55 }
 0x25a   : > { %2485 = vmatmul.mubr.bf16.gmra.mxu0 %v925_v50  ;;  %2546 = vmatprep.subr.bf16.mxu0 %v2752_v56 }
 0x25d   : > { %2547 = vmatpush3.bf16.msra.mxu0 %v2752_v56 }
 0x25e   : > { %2548 = vmatprep.subr.bf16.mxu0 %v2753_v57 }
 0x261   : > { %2549 = vmatpush3.bf16.msra.mxu0 %v2753_v57 }
 0x2e2   : > { %v2458_v58 = vpop.f32.mrf.mxu0 }
 0x2e3   : > { %v1042_v1 = vadd.f32 %v2458_v58, %v3253_v9 }
 0x2e4   : > { %v1033_v59 = vpop.f32.mrf.mxu0 }
 0x2e5   : > { %v1034_v63 = vadd.f32 %v3253_v9, %v1033_v59 }
 0x2e6   : > { %v2459_v60 = vpop.f32.mrf.mxu0 }
 0x2e7   : > { %v1045_v61 = vadd.f32 %v2459_v60, %v3253_v9 }
 0x2e8   : > { %v1036_v62 = vpop.f32.mrf.mxu0 }
 0x2e9   : > { %v1037_v0 = vadd.f32 %v3253_v9, %v1036_v62  ;;  %v1161_v5 = vpack.c.bf16 %v1045_v61, %v1042_v1 }
 0x2ea   : > { %v2462_v3 = vpop.f32.mrf.mxu0 }
 0x2eb   : > { %v1160_v4 = vpack.c.bf16 %v1037_v0, %v1034_v63  ;;  %v1058_v13 = vadd.f32 %v2462_v3, %v3253_v9 }
 0x2ec   : > { %v1049_v6 = vpop.f32.mrf.mxu0 }
 0x2ed   : > { %2504 = vmatprep.mubr.bf16.mxu1 %v1160_v4  ;;  %v1050_v11 = vadd.f32 %v3253_v9, %v1049_v6 }
 0x2ee   : > { %v2463_v7 = vpop.f32.mrf.mxu0  ;;  %2505 = vmatmul.mubr.bf16.vlgmr.msra.gmra.mxu1 %v1161_v5 }
 0x2ef   : > { %v1061_v8 = vadd.f32 %v2463_v7, %v3253_v9 }
 0x2f0   : > { %v1052_v10 = vpop.f32.mrf.mxu0 }
 0x2f1   : > { %v1053_v12 = vadd.f32 %v3253_v9, %v1052_v10  ;;  %v1163_v16 = vpack.c.bf16 %v1061_v8, %v1058_v13  ;;  %v2754_v13 = vld [vmem:[#allocation7 + $0xc0] sm:$0xff]  }
 0x2f2   : > { %v2466_v14 = vpop.f32.mrf.mxu0  ;;  %2550 = vmatprep.subr.bf16.mxu0 %v2754_v13 }
 0x2f3   : > { %v1162_v15 = vpack.c.bf16 %v1053_v12, %v1050_v11  ;;  %v1074_v23 = vadd.f32 %v2466_v14, %v3253_v9  ;;  %2551 = vmatpush3.bf16.msra.mxu0 %v2754_v13  ;;  %v2755_v14 = vld [vmem:[#allocation8 + $0x38] sm:$0xff]  }
 0x2f4   : > { %v1065_v17 = vpop.f32.mrf.mxu0  ;;  %2584 = vmatprep.subr.bf16.mxu1 %v2755_v14 }
 0x2f5   : > { %2508 = vmatprep.mubr.bf16.mxu1 %v1162_v15  ;;  %v1066_v21 = vadd.f32 %v3253_v9, %v1065_v17  ;;  %v2756_v15 = vld [vmem:[#allocation8 + $0x30] sm:$0xff]   ;;  %2585 = vmatpush3.bf16.msra.mxu1 %v2755_v14  ;;  %v2758_v17 = vld [vmem:[#allocation8 + $0x20] sm:$0xff]  }
 0x2f6   : > { %v2467_v18 = vpop.f32.mrf.mxu0  ;;  %2509 = vmatmul.mubr.bf16.gmra.mxu1 %v1163_v16  ;;  %2586 = vmatprep.subr.bf16.mxu1 %v2756_v15  ;;  %v2757_v16 = vld [vmem:[#allocation8 + $0x28] sm:$0xff]  }
 0x2f7   : > { %v1077_v19 = vadd.f32 %v2467_v18, %v3253_v9  ;;  %v2759_v18 = vld [vmem:[#allocation8 + $0x18] sm:$0xff]  }
 0x2f8   : > { %v1068_v20 = vpop.f32.mrf.mxu0 }
 0x2f9   : > { %v1069_v22 = vadd.f32 %v3253_v9, %v1068_v20  ;;  %v1165_v26 = vpack.c.bf16 %v1077_v19, %v1074_v23  ;;  %2587 = vmatpush3.bf16.msra.mxu1 %v2756_v15  ;;  %v2761_v19 = vld [vmem:[#allocation8 + $0x8] sm:$0xff]  }
 0x2fa   : > { %v2470_v24 = vpop.f32.mrf.mxu0  ;;  %2588 = vmatprep.subr.bf16.mxu1 %v2757_v16 }
 0x2fb   : > { %v1164_v25 = vpack.c.bf16 %v1069_v22, %v1066_v21  ;;  %v1090_v33 = vadd.f32 %v2470_v24, %v3253_v9  ;;  %v3290_v22 = vld [vmem:[%s3488_s4 + $0x3] ss:$0 sm:$0xff] }
 0x2fc   : > { %v1081_v27 = vpop.f32.mrf.mxu0 }
 0x2fd   : > { %2512 = vmatprep.mubr.bf16.mxu1 %v1164_v25  ;;  %v1082_v31 = vadd.f32 %v3253_v9, %v1081_v27  ;;  %2589 = vmatpush3.bf16.msra.mxu1 %v2757_v16 }
 0x2fe   : > { %v2471_v28 = vpop.f32.mrf.mxu0  ;;  %2513 = vmatmul.mubr.bf16.gmra.mxu1 %v1165_v26  ;;  %2590 = vmatprep.subr.bf16.mxu1 %v2758_v17 }
 0x2ff   : > { %v1093_v29 = vadd.f32 %v2471_v28, %v3253_v9 }
 0x300   : > { %v1084_v30 = vpop.f32.mrf.mxu0 }
 0x301   : > { %v1085_v32 = vadd.f32 %v3253_v9, %v1084_v30  ;;  %v1167_v36 = vpack.c.bf16 %v1093_v29, %v1090_v33  ;;  %2591 = vmatpush3.bf16.msra.mxu1 %v2758_v17 }
 0x302   : > { %v2474_v34 = vpop.f32.mrf.mxu0  ;;  %2592 = vmatprep.subr.bf16.mxu1 %v2759_v18 }
 0x303   : > { %v1166_v35 = vpack.c.bf16 %v1085_v32, %v1082_v31  ;;  %v1106_v43 = vadd.f32 %v2474_v34, %v3253_v9 }
 0x304   : > { %v1097_v37 = vpop.f32.mrf.mxu0 }
 0x305   : > { %2516 = vmatprep.mubr.bf16.mxu1 %v1166_v35  ;;  %v1098_v41 = vadd.f32 %v3253_v9, %v1097_v37  ;;  %2593 = vmatpush3.bf16.msra.mxu1 %v2759_v18 }
 0x306   : > { %v2475_v38 = vpop.f32.mrf.mxu0  ;;  %2517 = vmatmul.mubr.bf16.gmra.mxu1 %v1167_v36 }
 0x307   : > { %v1109_v39 = vadd.f32 %v2475_v38, %v3253_v9 }
 0x308   : > { %v1100_v40 = vpop.f32.mrf.mxu0 }
 0x309   : > { %v1101_v42 = vadd.f32 %v3253_v9, %v1100_v40  ;;  %v1169_v46 = vpack.c.bf16 %v1109_v39, %v1106_v43 }
 0x30a   : > { %v2478_v44 = vpop.f32.mrf.mxu0 }
 0x30b   : > { %v1168_v45 = vpack.c.bf16 %v1101_v42, %v1098_v41  ;;  %v1122_v53 = vadd.f32 %v2478_v44, %v3253_v9 }
 0x30c   : > { %v1113_v47 = vpop.f32.mrf.mxu0 }
 0x30d   : > { %2520 = vmatprep.mubr.bf16.mxu1 %v1168_v45  ;;  %v1114_v51 = vadd.f32 %v3253_v9, %v1113_v47 }
 0x30e   : > { %v2479_v48 = vpop.f32.mrf.mxu0  ;;  %2521 = vmatmul.mubr.bf16.gmra.mxu1 %v1169_v46 }
 0x30f   : > { %v1125_v49 = vadd.f32 %v2479_v48, %v3253_v9 }
 0x310   : > { %v1116_v50 = vpop.f32.mrf.mxu0 }
 0x311   : > { %v1117_v52 = vadd.f32 %v3253_v9, %v1116_v50  ;;  %v1171_v55 = vpack.c.bf16 %v1125_v49, %v1122_v53 }
 0x312   : > { %v2482_v54 = vpop.f32.mrf.mxu0 }
 0x313   : > { %v1170_v2 = vpack.c.bf16 %v1117_v52, %v1114_v51  ;;  %v1138_v62 = vadd.f32 %v2482_v54, %v3253_v9 }
 0x314   : > { %v1129_v56 = vpop.f32.mrf.mxu0 }
 0x315   : > { %2524 = vmatprep.mubr.bf16.mxu1 %v1170_v2  ;;  %v1130_v60 = vadd.f32 %v3253_v9, %v1129_v56 }
 0x316   : > { %v2483_v57 = vpop.f32.mrf.mxu0  ;;  %2525 = vmatmul.mubr.bf16.gmra.mxu1 %v1171_v55 }
 0x317   : > { %v1141_v58 = vadd.f32 %v2483_v57, %v3253_v9 }
 0x318   : > { %v1132_v59 = vpop.f32.mrf.mxu0 }
 0x319   : > { %v1133_v61 = vadd.f32 %v3253_v9, %v1132_v59  ;;  %v1173_v1 = vpack.c.bf16 %v1141_v58, %v1138_v62 }
 0x31a   : > { %v2486_v63 = vpop.f32.mrf.mxu0 }
 0x31b   : > { %v1172_v0 = vpack.c.bf16 %v1133_v61, %v1130_v60  ;;  %v1154_v10 = vadd.f32 %v2486_v63, %v3253_v9 }
 0x31c   : > { %v1145_v3 = vpop.f32.mrf.mxu0 }
 0x31d   : > { %2528 = vmatprep.mubr.bf16.mxu1 %v1172_v0  ;;  %v1146_v7 = vadd.f32 %v3253_v9, %v1145_v3 }
 0x31e   : > { %v2487_v4 = vpop.f32.mrf.mxu0  ;;  %2529 = vmatmul.mubr.bf16.gmra.mxu1 %v1173_v1 }
 0x31f   : > { %v1157_v5 = vadd.f32 %v2487_v4, %v3253_v9 }
 0x320   : > { %v1148_v6 = vpop.f32.mrf.mxu0 }
 0x321   : > { %v1149_v8 = vadd.f32 %v3253_v9, %v1148_v6  ;;  %v1175_v12 = vpack.c.bf16 %v1157_v5, %v1154_v10  ;;  %v2760_v9 = vld [vmem:[#allocation8 + $0x10] sm:$0xff]  }
 0x322   : > { %2594 = vmatprep.subr.bf16.mxu1 %v2760_v9 }
 0x323   : > { %v1174_v11 = vpack.c.bf16 %v1149_v8, %v1146_v7  ;;  %2595 = vmatpush3.bf16.msra.mxu1 %v2760_v9 }
 0x324   : > { %2596 = vmatprep.subr.bf16.mxu1 %v2761_v19 }
 0x325   : > { %2532 = vmatprep.mubr.bf16.mxu1 %v1174_v11 }
 0x326   : > { %2533 = vmatmul.mubr.bf16.gmra.mxu1 %v1175_v12 }
 0x327   : > { %2597 = vmatpush3.bf16.msra.mxu1 %v2761_v19 }
 0x3ae   : > { %v2506_v20 = vpop.f32.mrf.mxu1 }
 0x3af   : > { %v1292_v26 = vadd.f32 %v2506_v20, %v3290_v22 }
 0x3b0   : > { %v1283_v21 = vpop.f32.mrf.mxu1 }
 0x3b1   : > { %v1284_v24 = vadd.f32 %v3290_v22, %v1283_v21  ;;  %v1412_v33 = vmax.f32 %v1292_v26, 0.0 }
 0x3b2   : > { %v2507_v23 = vpop.f32.mrf.mxu1 }
 0x3b3   : > { %v1295_v25 = vadd.f32 %v2507_v23, %v3290_v22  ;;  %v1410_v31 = vmax.f32 %v1284_v24, 0.0 }
 0x3b4   : > { %v1286_v27 = vpop.f32.mrf.mxu1 }
 0x3b5   : > { %v1287_v28 = vadd.f32 %v3290_v22, %v1286_v27  ;;  %v1413_v29 = vmax.f32 %v1295_v25, 0.0 }
 0x3b6   : > { %v2510_v30 = vpop.f32.mrf.mxu1 }
 0x3b7   : > { %v1411_v32 = vmax.f32 %v1287_v28, 0.0  ;;  %v1443_v36 = vpack.c.bf16 %v1413_v29, %v1412_v33  ;;  %v1308_v40 = vadd.f32 %v2510_v30, %v3290_v22 }
 0x3b8   : > { %v1299_v34 = vpop.f32.mrf.mxu1 }
 0x3b9   : > { %v1442_v35 = vpack.c.bf16 %v1411_v32, %v1410_v31  ;;  %v1300_v38 = vadd.f32 %v3290_v22, %v1299_v34  ;;  %v1416_v47 = vmax.f32 %v1308_v40, 0.0 }
 0x3ba   : > { %v2511_v37 = vpop.f32.mrf.mxu1 }
 0x3bb   : > { %v1311_v39 = vadd.f32 %v2511_v37, %v3290_v22  ;;  %2552 = vmatprep.mubr.bf16.mxu0 %v1442_v35  ;;  %v1414_v45 = vmax.f32 %v1300_v38, 0.0 }
 0x3bc   : > { %v1302_v41 = vpop.f32.mrf.mxu1  ;;  %2553 = vmatmul.mubr.bf16.vlgmr.msra.gmra.mxu0 %v1443_v36 }
 0x3bd   : > { %v1303_v42 = vadd.f32 %v3290_v22, %v1302_v41  ;;  %v1417_v43 = vmax.f32 %v1311_v39, 0.0 }
 0x3be   : > { %v2514_v44 = vpop.f32.mrf.mxu1 }
 0x3bf   : > { %v1415_v46 = vmax.f32 %v1303_v42, 0.0  ;;  %v1445_v50 = vpack.c.bf16 %v1417_v43, %v1416_v47  ;;  %v1324_v54 = vadd.f32 %v2514_v44, %v3290_v22 }
 0x3c0   : > { %v1315_v48 = vpop.f32.mrf.mxu1 }
 0x3c1   : > { %v1444_v49 = vpack.c.bf16 %v1415_v46, %v1414_v45  ;;  %v1316_v52 = vadd.f32 %v3290_v22, %v1315_v48  ;;  %v1420_v60 = vmax.f32 %v1324_v54, 0.0 }
 0x3c2   : > { %v2515_v51 = vpop.f32.mrf.mxu1 }
 0x3c3   : > { %v1327_v53 = vadd.f32 %v2515_v51, %v3290_v22  ;;  %2556 = vmatprep.mubr.bf16.mxu0 %v1444_v49  ;;  %v1418_v58 = vmax.f32 %v1316_v52, 0.0 }
 0x3c4   : > { %v1318_v2 = vpop.f32.mrf.mxu1  ;;  %2557 = vmatmul.mubr.bf16.gmra.mxu0 %v1445_v50 }
 0x3c5   : > { %v1319_v55 = vadd.f32 %v3290_v22, %v1318_v2  ;;  %v1421_v56 = vmax.f32 %v1327_v53, 0.0 }
 0x3c6   : > { %v2518_v57 = vpop.f32.mrf.mxu1 }
 0x3c7   : > { %v1419_v59 = vmax.f32 %v1319_v55, 0.0  ;;  %v1447_v63 = vpack.c.bf16 %v1421_v56, %v1420_v60  ;;  %v1340_v4 = vadd.f32 %v2518_v57, %v3290_v22 }
 0x3c8   : > { %v1331_v61 = vpop.f32.mrf.mxu1 }
 0x3c9   : > { %v1446_v62 = vpack.c.bf16 %v1419_v59, %v1418_v58  ;;  %v1332_v1 = vadd.f32 %v3290_v22, %v1331_v61  ;;  %v1424_v12 = vmax.f32 %v1340_v4, 0.0 }
 0x3ca   : > { %v2519_v0 = vpop.f32.mrf.mxu1 }
 0x3cb   : > { %v1343_v3 = vadd.f32 %v2519_v0, %v3290_v22  ;;  %2560 = vmatprep.mubr.bf16.mxu0 %v1446_v62  ;;  %v1422_v10 = vmax.f32 %v1332_v1, 0.0 }
 0x3cc   : > { %v1334_v5 = vpop.f32.mrf.mxu1  ;;  %2561 = vmatmul.mubr.bf16.gmra.mxu0 %v1447_v63 }
 0x3cd   : > { %v1335_v6 = vadd.f32 %v3290_v22, %v1334_v5  ;;  %v1425_v7 = vmax.f32 %v1343_v3, 0.0 }
 0x3ce   : > { %v2522_v8 = vpop.f32.mrf.mxu1 }
 0x3cf   : > { %v1423_v11 = vmax.f32 %v1335_v6, 0.0  ;;  %v1449_v15 = vpack.c.bf16 %v1425_v7, %v1424_v12  ;;  %v1356_v9 = vadd.f32 %v2522_v8, %v3290_v22  ;;  %v2762_v6 = vld [vmem:[#allocation8] sm:$0xff]  }
 0x3d0   : > { %v1347_v13 = vpop.f32.mrf.mxu1  ;;  %2598 = vmatprep.subr.bf16.mxu1 %v2762_v6 }
 0x3d1   : > { %v1448_v14 = vpack.c.bf16 %v1423_v11, %v1422_v10  ;;  %v1348_v17 = vadd.f32 %v3290_v22, %v1347_v13  ;;  %v1428_v26 = vmax.f32 %v1356_v9, 0.0  ;;  %2599 = vmatpush3.bf16.msra.mxu1 %v2762_v6  ;;  %v3327_v10 = vld [vmem:[%s3488_s4 + $0x4] ss:$0 sm:$0xff] }
 0x3d2   : > { %v2523_v16 = vpop.f32.mrf.mxu1 }
 0x3d3   : > { %v1359_v18 = vadd.f32 %v2523_v16, %v3290_v22  ;;  %2564 = vmatprep.mubr.bf16.mxu0 %v1448_v14  ;;  %v1426_v24 = vmax.f32 %v1348_v17, 0.0 }
 0x3d4   : > { %v1350_v19 = vpop.f32.mrf.mxu1  ;;  %2565 = vmatmul.mubr.bf16.gmra.mxu0 %v1449_v15 }
 0x3d5   : > { %v1351_v20 = vadd.f32 %v3290_v22, %v1350_v19  ;;  %v1429_v21 = vmax.f32 %v1359_v18, 0.0 }
 0x3d6   : > { %v2526_v23 = vpop.f32.mrf.mxu1 }
 0x3d7   : > { %v1427_v25 = vmax.f32 %v1351_v20, 0.0  ;;  %v1451_v29 = vpack.c.bf16 %v1429_v21, %v1428_v26  ;;  %v1372_v33 = vadd.f32 %v2526_v23, %v3290_v22 }
 0x3d8   : > { %v1363_v27 = vpop.f32.mrf.mxu1 }
 0x3d9   : > { %v1450_v28 = vpack.c.bf16 %v1427_v25, %v1426_v24  ;;  %v1364_v31 = vadd.f32 %v3290_v22, %v1363_v27  ;;  %v1432_v40 = vmax.f32 %v1372_v33, 0.0 }
 0x3da   : > { %v2527_v30 = vpop.f32.mrf.mxu1 }
 0x3db   : > { %v1375_v32 = vadd.f32 %v2527_v30, %v3290_v22  ;;  %2568 = vmatprep.mubr.bf16.mxu0 %v1450_v28  ;;  %v1430_v38 = vmax.f32 %v1364_v31, 0.0 }
 0x3dc   : > { %v1366_v34 = vpop.f32.mrf.mxu1  ;;  %2569 = vmatmul.mubr.bf16.gmra.mxu0 %v1451_v29 }
 0x3dd   : > { %v1367_v35 = vadd.f32 %v3290_v22, %v1366_v34  ;;  %v1433_v36 = vmax.f32 %v1375_v32, 0.0 }
 0x3de   : > { %v2530_v37 = vpop.f32.mrf.mxu1 }
 0x3df   : > { %v1431_v39 = vmax.f32 %v1367_v35, 0.0  ;;  %v1453_v43 = vpack.c.bf16 %v1433_v36, %v1432_v40  ;;  %v1388_v47 = vadd.f32 %v2530_v37, %v3290_v22 }
 0x3e0   : > { %v1379_v41 = vpop.f32.mrf.mxu1 }
 0x3e1   : > { %v1452_v42 = vpack.c.bf16 %v1431_v39, %v1430_v38  ;;  %v1380_v45 = vadd.f32 %v3290_v22, %v1379_v41  ;;  %v1436_v54 = vmax.f32 %v1388_v47, 0.0 }
 0x3e2   : > { %v2531_v44 = vpop.f32.mrf.mxu1 }
 0x3e3   : > { %v1391_v46 = vadd.f32 %v2531_v44, %v3290_v22  ;;  %2572 = vmatprep.mubr.bf16.mxu0 %v1452_v42  ;;  %v1434_v52 = vmax.f32 %v1380_v45, 0.0 }
 0x3e4   : > { %v1382_v48 = vpop.f32.mrf.mxu1  ;;  %2573 = vmatmul.mubr.bf16.gmra.mxu0 %v1453_v43 }
 0x3e5   : > { %v1383_v49 = vadd.f32 %v3290_v22, %v1382_v48  ;;  %v1437_v50 = vmax.f32 %v1391_v46, 0.0 }
 0x3e6   : > { %v2534_v51 = vpop.f32.mrf.mxu1 }
 0x3e7   : > { %v1435_v53 = vmax.f32 %v1383_v49, 0.0  ;;  %v1455_v56 = vpack.c.bf16 %v1437_v50, %v1436_v54  ;;  %v1404_v60 = vadd.f32 %v2534_v51, %v3290_v22 }
 0x3e8   : > { %v1395_v2 = vpop.f32.mrf.mxu1 }
 0x3e9   : > { %v1454_v55 = vpack.c.bf16 %v1435_v53, %v1434_v52  ;;  %v1396_v58 = vadd.f32 %v3290_v22, %v1395_v2  ;;  %v1440_v3 = vmax.f32 %v1404_v60, 0.0 }
 0x3ea   : > { %v2535_v57 = vpop.f32.mrf.mxu1 }
 0x3eb   : > { %v1407_v59 = vadd.f32 %v2535_v57, %v3290_v22  ;;  %2576 = vmatprep.mubr.bf16.mxu0 %v1454_v55  ;;  %v1438_v0 = vmax.f32 %v1396_v58, 0.0 }
 0x3ec   : > { %v1398_v61 = vpop.f32.mrf.mxu1  ;;  %2577 = vmatmul.mubr.bf16.gmra.mxu0 %v1455_v56 }
 0x3ed   : > { %v1399_v62 = vadd.f32 %v3290_v22, %v1398_v61  ;;  %v1441_v63 = vmax.f32 %v1407_v59, 0.0 }
 0x3ef   : > { %v1439_v1 = vmax.f32 %v1399_v62, 0.0  ;;  %v1457_v5 = vpack.c.bf16 %v1441_v63, %v1440_v3 }
 0x3f1   : > { %v1456_v4 = vpack.c.bf16 %v1439_v1, %v1438_v0 }
 0x3f3   : > { %2580 = vmatprep.mubr.bf16.mxu0 %v1456_v4 }
 0x3f4   : > { %2581 = vmatmul.mubr.bf16.gmra.mxu0 %v1457_v5 }
 0x47c   : > { %v2554_v7 = vpop.f32.mrf.mxu0 }
 0x47d   : > { %v1574_v13 = vadd.f32 %v2554_v7, %v3327_v10 }
 0x47e   : > { %v1565_v8 = vpop.f32.mrf.mxu0 }
 0x47f   : > { %v1566_v22 = vadd.f32 %v3327_v10, %v1565_v8  ;;  %v1694_v19 = vmax.f32 %v1574_v13, 0.0 }
 0x480   : > { %v2555_v11 = vpop.f32.mrf.mxu0 }
 0x481   : > { %v1577_v12 = vadd.f32 %v2555_v11, %v3327_v10  ;;  %v1692_v18 = vmax.f32 %v1566_v22, 0.0 }
 0x482   : > { %v1568_v14 = vpop.f32.mrf.mxu0 }
 0x483   : > { %v1569_v15 = vadd.f32 %v3327_v10, %v1568_v14  ;;  %v1695_v16 = vmax.f32 %v1577_v12, 0.0 }
 0x484   : > { %v2558_v17 = vpop.f32.mrf.mxu0 }
 0x485   : > { %v1693_v9 = vmax.f32 %v1569_v15, 0.0  ;;  %v1725_v23 = vpack.c.bf16 %v1695_v16, %v1694_v19  ;;  %v1590_v27 = vadd.f32 %v2558_v17, %v3327_v10 }
 0x486   : > { %v1581_v20 = vpop.f32.mrf.mxu0 }
 0x487   : > { %v1724_v21 = vpack.c.bf16 %v1693_v9, %v1692_v18  ;;  %v1582_v25 = vadd.f32 %v3327_v10, %v1581_v20  ;;  %v1698_v34 = vmax.f32 %v1590_v27, 0.0 }
 0x488   : > { %v2559_v24 = vpop.f32.mrf.mxu0 }
 0x489   : > { %v1593_v26 = vadd.f32 %v2559_v24, %v3327_v10  ;;  %2600 = vmatprep.mubr.bf16.mxu1 %v1724_v21  ;;  %v1696_v32 = vmax.f32 %v1582_v25, 0.0 }
 0x48a   : > { %v1584_v28 = vpop.f32.mrf.mxu0  ;;  %2601 = vmatmul.mubr.bf16.vlgmr.msra.gmra.mxu1 %v1725_v23 }
 0x48b   : > { %v1585_v29 = vadd.f32 %v3327_v10, %v1584_v28  ;;  %v1699_v30 = vmax.f32 %v1593_v26, 0.0 }
 0x48c   : > { %v2562_v31 = vpop.f32.mrf.mxu0 }
 0x48d   : > { %v1697_v33 = vmax.f32 %v1585_v29, 0.0  ;;  %v1727_v37 = vpack.c.bf16 %v1699_v30, %v1698_v34  ;;  %v1606_v41 = vadd.f32 %v2562_v31, %v3327_v10 }
 0x48e   : > { %v1597_v35 = vpop.f32.mrf.mxu0 }
 0x48f   : > { %v1726_v36 = vpack.c.bf16 %v1697_v33, %v1696_v32  ;;  %v1598_v39 = vadd.f32 %v3327_v10, %v1597_v35  ;;  %v1702_v48 = vmax.f32 %v1606_v41, 0.0 }
 0x490   : > { %v2563_v38 = vpop.f32.mrf.mxu0 }
 0x491   : > { %v1609_v40 = vadd.f32 %v2563_v38, %v3327_v10  ;;  %2604 = vmatprep.mubr.bf16.mxu1 %v1726_v36  ;;  %v1700_v46 = vmax.f32 %v1598_v39, 0.0 }
 0x492   : > { %v1600_v42 = vpop.f32.mrf.mxu0  ;;  %2605 = vmatmul.mubr.bf16.gmra.mxu1 %v1727_v37 }
 0x493   : > { %v1601_v43 = vadd.f32 %v3327_v10, %v1600_v42  ;;  %v1703_v44 = vmax.f32 %v1609_v40, 0.0 }
 0x494   : > { %v2566_v45 = vpop.f32.mrf.mxu0 }
 0x495   : > { %v1701_v47 = vmax.f32 %v1601_v43, 0.0  ;;  %v1729_v51 = vpack.c.bf16 %v1703_v44, %v1702_v48  ;;  %v1622_v2 = vadd.f32 %v2566_v45, %v3327_v10 }
 0x496   : > { %v1613_v49 = vpop.f32.mrf.mxu0 }
 0x497   : > { %v1728_v50 = vpack.c.bf16 %v1701_v47, %v1700_v46  ;;  %v1614_v53 = vadd.f32 %v3327_v10, %v1613_v49  ;;  %v1706_v61 = vmax.f32 %v1622_v2, 0.0 }
 0x498   : > { %v2567_v52 = vpop.f32.mrf.mxu0 }
 0x499   : > { %v1625_v54 = vadd.f32 %v2567_v52, %v3327_v10  ;;  %2608 = vmatprep.mubr.bf16.mxu1 %v1728_v50  ;;  %v1704_v59 = vmax.f32 %v1614_v53, 0.0 }
 0x49a   : > { %v1616_v55 = vpop.f32.mrf.mxu0  ;;  %2609 = vmatmul.mubr.bf16.gmra.mxu1 %v1729_v51 }
 0x49b   : > { %v1617_v56 = vadd.f32 %v3327_v10, %v1616_v55  ;;  %v1707_v57 = vmax.f32 %v1625_v54, 0.0 }
 0x49c   : > { %v2570_v58 = vpop.f32.mrf.mxu0 }
 0x49d   : > { %v1705_v60 = vmax.f32 %v1617_v56, 0.0  ;;  %v1731_v0 = vpack.c.bf16 %v1707_v57, %v1706_v61  ;;  %v1638_v5 = vadd.f32 %v2570_v58, %v3327_v10  ;;  %v3364_v56 = vld [vmem:[%s3489_s5] ss:$0 sm:$0xff] }
 0x49e   : > { %v1629_v62 = vpop.f32.mrf.mxu0 }
 0x49f   : > { %v1730_v63 = vpack.c.bf16 %v1705_v60, %v1704_v59  ;;  %v1630_v3 = vadd.f32 %v3327_v10, %v1629_v62  ;;  %v1710_v13 = vmax.f32 %v1638_v5, 0.0 }
 0x4a0   : > { %v2571_v1 = vpop.f32.mrf.mxu0 }
 0x4a1   : > { %v1641_v4 = vadd.f32 %v2571_v1, %v3327_v10  ;;  %2612 = vmatprep.mubr.bf16.mxu1 %v1730_v63  ;;  %v1708_v22 = vmax.f32 %v1630_v3, 0.0 }
 0x4a2   : > { %v1632_v6 = vpop.f32.mrf.mxu0  ;;  %2613 = vmatmul.mubr.bf16.gmra.mxu1 %v1731_v0 }
 0x4a3   : > { %v1633_v7 = vadd.f32 %v3327_v10, %v1632_v6  ;;  %v1711_v8 = vmax.f32 %v1641_v4, 0.0 }
 0x4a4   : > { %v2574_v11 = vpop.f32.mrf.mxu0 }
 0x4a5   : > { %v1709_v12 = vmax.f32 %v1633_v7, 0.0  ;;  %v1733_v16 = vpack.c.bf16 %v1711_v8, %v1710_v13  ;;  %v1654_v19 = vadd.f32 %v2574_v11, %v3327_v10 }
 0x4a6   : > { %v1645_v14 = vpop.f32.mrf.mxu0 }
 0x4a7   : > { %v1732_v15 = vpack.c.bf16 %v1709_v12, %v1708_v22  ;;  %v1646_v18 = vadd.f32 %v3327_v10, %v1645_v14  ;;  %v1714_v27 = vmax.f32 %v1654_v19, 0.0 }
 0x4a8   : > { %v2575_v17 = vpop.f32.mrf.mxu0 }
 0x4a9   : > { %v1657_v9 = vadd.f32 %v2575_v17, %v3327_v10  ;;  %2616 = vmatprep.mubr.bf16.mxu1 %v1732_v15  ;;  %v1712_v25 = vmax.f32 %v1646_v18, 0.0 }
 0x4aa   : > { %v1648_v20 = vpop.f32.mrf.mxu0  ;;  %2617 = vmatmul.mubr.bf16.gmra.mxu1 %v1733_v16 }
 0x4ab   : > { %v1649_v21 = vadd.f32 %v3327_v10, %v1648_v20  ;;  %v1715_v23 = vmax.f32 %v1657_v9, 0.0 }
 0x4ac   : > { %v2578_v24 = vpop.f32.mrf.mxu0 }
 0x4ad   : > { %v1713_v26 = vmax.f32 %v1649_v21, 0.0  ;;  %v1735_v30 = vpack.c.bf16 %v1715_v23, %v1714_v27  ;;  %v1670_v34 = vadd.f32 %v2578_v24, %v3327_v10 }
 0x4ae   : > { %v1661_v28 = vpop.f32.mrf.mxu0 }
 0x4af   : > { %v1734_v29 = vpack.c.bf16 %v1713_v26, %v1712_v25  ;;  %v1662_v32 = vadd.f32 %v3327_v10, %v1661_v28  ;;  %v1718_v41 = vmax.f32 %v1670_v34, 0.0 }
 0x4b0   : > { %v2579_v31 = vpop.f32.mrf.mxu0 }
 0x4b1   : > { %v1673_v33 = vadd.f32 %v2579_v31, %v3327_v10  ;;  %2620 = vmatprep.mubr.bf16.mxu1 %v1734_v29  ;;  %v1716_v39 = vmax.f32 %v1662_v32, 0.0 }
 0x4b2   : > { %v1664_v35 = vpop.f32.mrf.mxu0  ;;  %2621 = vmatmul.mubr.bf16.gmra.mxu1 %v1735_v30 }
 0x4b3   : > { %v1665_v36 = vadd.f32 %v3327_v10, %v1664_v35  ;;  %v1719_v37 = vmax.f32 %v1673_v33, 0.0 }
 0x4b4   : > { %v2582_v38 = vpop.f32.mrf.mxu0 }
 0x4b5   : > { %v1717_v40 = vmax.f32 %v1665_v36, 0.0  ;;  %v1737_v44 = vpack.c.bf16 %v1719_v37, %v1718_v41  ;;  %v1686_v48 = vadd.f32 %v2582_v38, %v3327_v10 }
 0x4b6   : > { %v1677_v42 = vpop.f32.mrf.mxu0 }
 0x4b7   : > { %v1736_v43 = vpack.c.bf16 %v1717_v40, %v1716_v39  ;;  %v1678_v46 = vadd.f32 %v3327_v10, %v1677_v42  ;;  %v1722_v54 = vmax.f32 %v1686_v48, 0.0 }
 0x4b8   : > { %v2583_v45 = vpop.f32.mrf.mxu0 }
 0x4b9   : > { %v1689_v47 = vadd.f32 %v2583_v45, %v3327_v10  ;;  %2624 = vmatprep.mubr.bf16.mxu1 %v1736_v43  ;;  %v1720_v52 = vmax.f32 %v1678_v46, 0.0 }
 0x4ba   : > { %v1680_v49 = vpop.f32.mrf.mxu0  ;;  %2625 = vmatmul.mubr.bf16.gmra.mxu1 %v1737_v44 }
 0x4bb   : > { %v1681_v50 = vadd.f32 %v3327_v10, %v1680_v49  ;;  %v1723_v51 = vmax.f32 %v1689_v47, 0.0 }
 0x4bd   : > { %v1721_v53 = vmax.f32 %v1681_v50, 0.0  ;;  %v1739_v55 = vpack.c.bf16 %v1723_v51, %v1722_v54 }
 0x4bf   : > { %v1738_v2 = vpack.c.bf16 %v1721_v53, %v1720_v52 }
 0x4c1   : > { %2628 = vmatprep.mubr.bf16.mxu1 %v1738_v2 }
 0x4c2   : > { %2629 = vmatmul.mubr.bf16.gmra.mxu1 %v1739_v55 }
 0x54a   : > { %v2602_v57 = vpop.f32.mrf.mxu1 }
 0x54b   : > { %v1854_v58 = vadd.f32 %v2602_v57, %v3364_v56 }
 0x54c   : > { %v1845_v59 = vpop.f32.mrf.mxu1 }
 0x54d   : > { %1974 = vst [vmem:[%s3369_s16 + $0x10] sm:$0xff] %v1854_v58  ;;  %v1846_v10 = vadd.f32 %v3364_v56, %v1845_v59 }
 0x54e   : > { %v2603_v60 = vpop.f32.mrf.mxu1 }
 0x54f   : > { %1972 = vst [vmem:[%s3369_s16] sm:$0xff] %v1846_v10  ;;  %v1857_v61 = vadd.f32 %v2603_v60, %v3364_v56 }
 0x550   : > { %v1848_v62 = vpop.f32.mrf.mxu1 }
 0x551   : > { %1975 = vst [vmem:[%s3369_s16 + $0x18] sm:$0xff] %v1857_v61  ;;  %v1849_v63 = vadd.f32 %v3364_v56, %v1848_v62 }
 0x552   : > { %v2606_v0 = vpop.f32.mrf.mxu1 }
 0x553   : > { %1973 = vst [vmem:[%s3369_s16 + $0x8] sm:$0xff] %v1849_v63  ;;  %v1870_v1 = vadd.f32 %v2606_v0, %v3364_v56 }
 0x554   : > { %v1861_v3 = vpop.f32.mrf.mxu1 }
 0x555   : > { %1978 = vst [vmem:[%s3369_s16 + $0x30] sm:$0xff] %v1870_v1  ;;  %v1862_v4 = vadd.f32 %v3364_v56, %v1861_v3 }
 0x556   : > { %v2607_v5 = vpop.f32.mrf.mxu1 }
 0x557   : > { %1976 = vst [vmem:[%s3369_s16 + $0x20] sm:$0xff] %v1862_v4  ;;  %v1873_v6 = vadd.f32 %v2607_v5, %v3364_v56 }
 0x558   : > { %v1864_v7 = vpop.f32.mrf.mxu1 }
 0x559   : > { %1979 = vst [vmem:[%s3369_s16 + $0x38] sm:$0xff] %v1873_v6  ;;  %v1865_v8 = vadd.f32 %v3364_v56, %v1864_v7 }
 0x55a   : > { %v2610_v11 = vpop.f32.mrf.mxu1 }
 0x55b   : > { %1977 = vst [vmem:[%s3369_s16 + $0x28] sm:$0xff] %v1865_v8  ;;  %v1886_v22 = vadd.f32 %v2610_v11, %v3364_v56 }
 0x55c   : > { %v1877_v12 = vpop.f32.mrf.mxu1 }
 0x55d   : > { %1982 = vst [vmem:[%s3369_s16 + $0x50] sm:$0xff] %v1886_v22  ;;  %v1878_v13 = vadd.f32 %v3364_v56, %v1877_v12 }
 0x55e   : > { %v2611_v14 = vpop.f32.mrf.mxu1 }
 0x55f   : > { %1980 = vst [vmem:[%s3369_s16 + $0x40] sm:$0xff] %v1878_v13  ;;  %v1889_v15 = vadd.f32 %v2611_v14, %v3364_v56 }
 0x560   : > { %v1880_v16 = vpop.f32.mrf.mxu1 }
 0x561   : > { %1983 = vst [vmem:[%s3369_s16 + $0x58] sm:$0xff] %v1889_v15  ;;  %v1881_v17 = vadd.f32 %v3364_v56, %v1880_v16 }
 0x562   : > { %v2614_v18 = vpop.f32.mrf.mxu1 }
 0x563   : > { %1981 = vst [vmem:[%s3369_s16 + $0x48] sm:$0xff] %v1881_v17  ;;  %v1902_v9 = vadd.f32 %v2614_v18, %v3364_v56 }
 0x564   : > { %v1893_v19 = vpop.f32.mrf.mxu1 }
 0x565   : > { %1986 = vst [vmem:[%s3369_s16 + $0x70] sm:$0xff] %v1902_v9  ;;  %v1894_v20 = vadd.f32 %v3364_v56, %v1893_v19 }
 0x566   : > { %v2615_v21 = vpop.f32.mrf.mxu1 }
 0x567   : > { %1984 = vst [vmem:[%s3369_s16 + $0x60] sm:$0xff] %v1894_v20  ;;  %v1905_v23 = vadd.f32 %v2615_v21, %v3364_v56 }
 0x568   : > { %v1896_v24 = vpop.f32.mrf.mxu1 }
 0x569   : > { %1987 = vst [vmem:[%s3369_s16 + $0x78] sm:$0xff] %v1905_v23  ;;  %v1897_v25 = vadd.f32 %v3364_v56, %v1896_v24 }
 0x56a   : > { %v2618_v26 = vpop.f32.mrf.mxu1 }
 0x56b   : > { %1985 = vst [vmem:[%s3369_s16 + $0x68] sm:$0xff] %v1897_v25  ;;  %v1918_v27 = vadd.f32 %v2618_v26, %v3364_v56 }
 0x56c   : > { %v1909_v28 = vpop.f32.mrf.mxu1 }
 0x56d   : > { %1990 = vst [vmem:[%s3369_s16 + $0x90] sm:$0xff] %v1918_v27  ;;  %v1910_v29 = vadd.f32 %v3364_v56, %v1909_v28 }
 0x56e   : > { %v2619_v30 = vpop.f32.mrf.mxu1 }
 0x56f   : > { %1988 = vst [vmem:[%s3369_s16 + $0x80] sm:$0xff] %v1910_v29  ;;  %v1921_v31 = vadd.f32 %v2619_v30, %v3364_v56 }
 0x570   : > { %v1912_v32 = vpop.f32.mrf.mxu1 }
 0x571   : > { %1991 = vst [vmem:[%s3369_s16 + $0x98] sm:$0xff] %v1921_v31  ;;  %v1913_v33 = vadd.f32 %v3364_v56, %v1912_v32 }
 0x572   : > { %v2622_v34 = vpop.f32.mrf.mxu1 }
 0x573   : > { %1989 = vst [vmem:[%s3369_s16 + $0x88] sm:$0xff] %v1913_v33  ;;  %v1934_v35 = vadd.f32 %v2622_v34, %v3364_v56 }
 0x574   : > { %v1925_v36 = vpop.f32.mrf.mxu1 }
 0x575   : > { %1994 = vst [vmem:[%s3369_s16 + $0xb0] sm:$0xff] %v1934_v35  ;;  %v1926_v37 = vadd.f32 %v3364_v56, %v1925_v36 }
 0x576   : > { %v2623_v38 = vpop.f32.mrf.mxu1 }
 0x577   : > { %1992 = vst [vmem:[%s3369_s16 + $0xa0] sm:$0xff] %v1926_v37  ;;  %v1937_v39 = vadd.f32 %v2623_v38, %v3364_v56 }
 0x578   : > { %v1928_v40 = vpop.f32.mrf.mxu1 }
 0x579   : > { %1995 = vst [vmem:[%s3369_s16 + $0xb8] sm:$0xff] %v1937_v39  ;;  %v1929_v41 = vadd.f32 %v3364_v56, %v1928_v40 }
 0x57a   : > { %v2626_v42 = vpop.f32.mrf.mxu1 }
 0x57b   : > { %1993 = vst [vmem:[%s3369_s16 + $0xa8] sm:$0xff] %v1929_v41  ;;  %v1950_v43 = vadd.f32 %v2626_v42, %v3364_v56 }
 0x57c   : > { %v1941_v44 = vpop.f32.mrf.mxu1 }
 0x57d   : > { %1998 = vst [vmem:[%s3369_s16 + $0xd0] sm:$0xff] %v1950_v43  ;;  %v1942_v45 = vadd.f32 %v3364_v56, %v1941_v44 }
 0x57e   : > { %v2627_v46 = vpop.f32.mrf.mxu1 }
 0x57f   : > { %1996 = vst [vmem:[%s3369_s16 + $0xc0] sm:$0xff] %v1942_v45  ;;  %v1953_v47 = vadd.f32 %v2627_v46, %v3364_v56 }
 0x580   : > { %v1944_v48 = vpop.f32.mrf.mxu1 }
 0x581   : > { %1999 = vst [vmem:[%s3369_s16 + $0xd8] sm:$0xff] %v1953_v47  ;;  %v1945_v49 = vadd.f32 %v3364_v56, %v1944_v48 }
 0x582   : > { %v2630_v50 = vpop.f32.mrf.mxu1 }
 0x583   : > { %1997 = vst [vmem:[%s3369_s16 + $0xc8] sm:$0xff] %v1945_v49  ;;  %v1966_v51 = vadd.f32 %v2630_v50, %v3364_v56 }
 0x584   : > { %v1957_v52 = vpop.f32.mrf.mxu1 }
 0x585   : > { %2002 = vst [vmem:[%s3369_s16 + $0xf0] sm:$0xff] %v1966_v51  ;;  %v1958_v53 = vadd.f32 %v3364_v56, %v1957_v52 }
 0x586   : > { %v2631_v54 = vpop.f32.mrf.mxu1 }
 0x587   : > { %2000 = vst [vmem:[%s3369_s16 + $0xe0] sm:$0xff] %v1958_v53  ;;  %v1969_v2 = vadd.f32 %v2631_v54, %v3364_v56 }
 0x588   : > { %v1960_v55 = vpop.f32.mrf.mxu1 }
 0x589   : > { %2003 = vst [vmem:[%s3369_s16 + $0xf8] sm:$0xff] %v1969_v2  ;;  %v1961_v57 = vadd.f32 %v3364_v56, %v1960_v55 }
 0x58b   : > { %2001 = vst [vmem:[%s3369_s16 + $0xe8] sm:$0xff] %v1961_v57 }
 0x58c   : > { %2882 = shalt.err (!%p2879_p9)
}
 0x58d   : > { %s2883_s10 = scalar_lea.hbm %s3436_s20, 4096  ;;  %s2887_s14 = scalar_lea.hbm %s3490_s6, 8192 }
 0x58e   : > { %p2884_p1 = scmp.ne.s32.totalorder %s3436_s20, %s2883_s10  ;;  %p2888_p11 = scmp.lt.s32.totalorder %s3436_s20, %s3490_s6 }
 0x58f   : > { %p2889_p13 = scmp.lt.s32.totalorder %s2887_s14, %s2883_s10 }
 0x590   : > { %p2885_p8 = pnand %p2884_p1, %p3508_p6 }
 0x591   : > { %p2890_p2 = por %p2889_p13, %p2888_p11 }
 0x592   : > { %p2886_p10 = pneg %p2885_p8 }
 0x594   : > { %p2891_p4 = pnand %p2890_p2, %p2886_p10 }
 0x596   : > { %2894 = shalt.err (!%p2891_p4)
}
 0x597   : > { %s2952_s29 = smov 128   ;;  %s2953_s18 = smov 8  }
 0x598   : > { %2646 = dma.vmem_to_hbm [thread:$0]  (%p3508_p6), %s3438_s27, 4096, %s3436_s20, %s2005_s25, %s2952_s29, %s2952_s29, %s2953_s18  }
 0x599 PF: > { %s2033_s26 = sand.u32 1, %s2929_s21   ;;  %p3509_p12 = scmp.ne.s32.totalorder %s3496_s28, 0 }
 0x59a   : > { %p3510_p0 = scmp.ge.s32.totalorder %s2941_s24, 2  ;;  %s2034_s30 = scalar_lea.sflag [#allocation4], %s2033_s26 }
 0x59c   : > { %p2663_p5 = pnand %p3510_p0, %p3509_p12 }
 0x59e   : > { %p2664_p3 = pneg %p2663_p5 }
 0x5a0   : > { %2924 = dma.done.wait (%p2664_p3), %s2034_s30, 4096  }
 0x5a1   : > { %2926 = vsyncadd (%p2664_p3), %s2034_s30, 4294963200  ;;  %p21_p7 = scmp.ge.s32.totalorder %s3069_s9, 4   ;;  %s3511_s21 = smov %s2933_s22 }
 0x5a2   : > { %s3512_s22 = smov %s2937_s23  ;;  %s3513_s23 = smov %s3079_s11 }
 0x5a3   : > { %s3514_s24 = smov %s3069_s9  ;;  %23 = sbr.rel (!%p21_p7) target bundleno = 7 (0x7), region = 108 }
 0x5a8   :  { %2039 = vsyncpa [#allocation3], 1 }
 0x5a9   :  { %2041 = vsyncpa [#allocation3 + $0x1], 1 }
 0x5aa   :  { %2042 = vsyncpa [#allocation6], 1 }
 0x5ab   :  { %2043 = vsyncpa [#allocation9], 1 }
 0x5ac   :  { %2044 = vsyncpa [#allocation4], 1 }
 0x5ad   :  { %2046 = vsyncpa [#allocation4 + $0x1], 1 }

</bundles_post_ra>
